<compile_context>
chip_gen: v7x
topology: tpu7x:2x2x1
jax: 0.10.0
libtpu: 0.0.40
codegen_flags: <defaults>
</compile_context>

<pallas_src>
import jax
import jax.numpy as jnp
from jax.experimental import pallas as pl
from jax.experimental.pallas import tpu as pltpu

# ---------------- small synthetic config ----------------
SEQ = 8
HIDDEN = 128
NUM_HEADS = 4
NUM_KV_HEADS = 2
HEAD_DIM = HIDDEN // NUM_HEADS          # 32
Q_SIZE = NUM_HEADS * HEAD_DIM           # 128
KV_SIZE = NUM_KV_HEADS * HEAD_DIM       # 64
SCALE = HEAD_DIM ** -0.5
RMS_EPS = 1e-5
ROPE_THETA = 500000.0
MOE_NUM_EXPERTS = 4
MOE_K = 2
MOE_INTER = 64
MOE_NUM_SHARED = 1
SHARED_INTER = MOE_INTER * MOE_NUM_SHARED


# ---------------- fused decoder-layer kernel ----------------
def _ernie_moe_decoder_layer_kernel(
    x_ref, res_ref, ln1_ref, ln2_ref,
    wqa_ref, wqb_ref, wka_ref, wkb_ref, wv_ref, wo_ref,
    cosq_ref, sinq_ref,
    wg_ref, bias_ref, wsh_gu_ref, wsh_dn_ref, wexp_gu_ref, wexp_dn_ref,
    out_ref, res_out_ref,
    attn_vmem,
):
    f32 = jnp.float32
    bf16 = jnp.bfloat16

    # ---- input RMSNorm (fused residual add; residual-None handled by passing
    #      zeros, which makes s1 == hidden_states) ----
    s1 = x_ref[...].astype(f32) + res_ref[...].astype(f32)
    h1 = s1 * jax.lax.rsqrt(jnp.mean(s1 * s1, axis=-1, keepdims=True) + RMS_EPS)
    h1 = h1 * ln1_ref[...].astype(f32)
    h1b = h1.astype(bf16)                          # bf16 MXU input, f32 accum

    # ---- QKV projection with interleaved RoPE folded in via pre-permuted
    #      bf16 weight pairs (A = per-head [even|odd] layout, B = half-swapped)
    #      and precomputed signed cos/sin tables.  The k tables are just the
    #      first KV_SIZE lanes of the q tables (same per-head tile). ----
    cos_q = cosq_ref[...]                          # (T, Q_SIZE) f32
    sin_q = sinq_ref[...]
    cos_k = cos_q[:, :KV_SIZE]
    sin_k = sin_q[:, :KV_SIZE]
    q = (jnp.dot(h1b, wqa_ref[...], preferred_element_type=f32) * cos_q
         + jnp.dot(h1b, wqb_ref[...], preferred_element_type=f32) * sin_q)
    k = (jnp.dot(h1b, wka_ref[...], preferred_element_type=f32) * cos_k
         + jnp.dot(h1b, wkb_ref[...], preferred_element_type=f32) * sin_k)
    v = jnp.dot(h1b, wv_ref[...], preferred_element_type=f32)

    # ---- causal GQA attention, batched over heads (single dot_general per
    #      phase with NUM_HEADS as the batch dim; kv heads repeated by slicing
    #      the same lane block).  Scores / softmax stay f32. ----
    t = s1.shape[0]
    row = jax.lax.broadcasted_iota(jnp.int32, (t, t), 0)
    col = jax.lax.broadcasted_iota(jnp.int32, (t, t), 1)
    causal = col <= row
    group = NUM_HEADS // NUM_KV_HEADS
    q_h = jnp.stack(
        [q[:, h * HEAD_DIM:(h + 1) * HEAD_DIM] for h in range(NUM_HEADS)],
        axis=0).astype(bf16)                                   # (H, T, D)
    k_h = jnp.stack(
        [k[:, (h // group) * HEAD_DIM:((h // group) + 1) * HEAD_DIM]
         for h in range(NUM_HEADS)], axis=0).astype(bf16)      # GQA repeat
    v_h = jnp.stack(
        [v[:, (h // group) * HEAD_DIM:((h // group) + 1) * HEAD_DIM]
         for h in range(NUM_HEADS)], axis=0).astype(bf16)
    sc = jnp.einsum('hqd,hkd->hqk', q_h, k_h,
                    preferred_element_type=f32) * SCALE        # (H, T, T) f32
    sc = jnp.where(causal[None], sc, -1e30)
    p = jnp.exp(sc - jnp.max(sc, axis=-1, keepdims=True))
    p = p * pl.reciprocal(jnp.sum(p, axis=-1, keepdims=True), approx=True)
    o_h = jnp.einsum('hqk,hkd->hqd', p.astype(bf16), v_h,
                     preferred_element_type=f32)               # (H, T, D) f32

    # Re-assemble the lane-dense (T, Q_SIZE) attention slab via VMEM scratch
    # stores (no in-register lane concatenation), then one o_proj matmul.
    for h in range(NUM_HEADS):                                 # static unroll
        attn_vmem[:, h * HEAD_DIM:(h + 1) * HEAD_DIM] = o_h[h]
    attn_o = jnp.dot(attn_vmem[...].astype(bf16), wo_ref[...],
                     preferred_element_type=f32)

    # ---- post-attention RMSNorm (fused residual add); this sum is the layer's
    #      returned residual ----
    s2 = attn_o + s1
    res_out_ref[...] = s2.astype(res_out_ref.dtype)
    h2 = s2 * jax.lax.rsqrt(jnp.mean(s2 * s2, axis=-1, keepdims=True) + RMS_EPS)
    h2 = h2 * ln2_ref[...].astype(f32)
    h2b = h2.astype(bf16)

    # ---- shared expert MLP (SiluAndMul) initializes the accumulator ----
    gu = jnp.dot(h2b, wsh_gu_ref[...], preferred_element_type=f32)
    h_sh = (jax.nn.silu(gu[:, :SHARED_INTER]) * gu[:, SHARED_INTER:]).astype(bf16)
    acc = jnp.dot(h_sh, wsh_dn_ref[...], preferred_element_type=f32)

    # ---- router: f32 softmax -> bias-corrected top-k -> renormalize.
    #      Exact division (not approx reciprocal) for parity with vLLM's
    #      routing weights; the EUP approximation is used only in attention. ----
    logits = jnp.dot(h2, wg_ref[...], preferred_element_type=f32)   # f32 (T, E)
    z = jnp.exp(logits - jnp.max(logits, axis=-1, keepdims=True))
    probs = z / jnp.sum(z, axis=-1, keepdims=True)
    corrected = probs + bias_ref[...].astype(f32)
    iota_e = jax.lax.broadcasted_iota(jnp.int32, probs.shape, 1)
    selected = jnp.zeros(probs.shape, jnp.bool_)
    work = corrected
    for _ in range(MOE_K):                                     # static unroll
        is_max = work == jnp.max(work, axis=-1, keepdims=True)
        arg = jnp.min(jnp.where(is_max, iota_e, MOE_NUM_EXPERTS),
                      axis=-1, keepdims=True)
        pick = iota_e == arg
        selected = jnp.logical_or(selected, pick)
        work = jnp.where(pick, -1e30, work)
    route_w = jnp.where(selected, probs, 0.0)
    route_w = route_w / jnp.sum(route_w, axis=-1, keepdims=True)

    # ---- routed experts (dense weighted evaluation at toy size, bf16 matmul
    #      inputs, f32 accumulation, single lane-dense store at the end) ----
    # TODO(synk): for real Ernie shapes (E=64), switch to scalar-prefetch token
    #             grouping (PrefetchScalarGridSpec) with an expert grid axis so
    #             expert weights stream through BlockSpecs (mandatory on v7x's
    #             64 MiB VMEM) instead of dense masked evaluation.
    for e in range(MOE_NUM_EXPERTS):                           # static unroll
        gu_e = jnp.dot(h2b, wexp_gu_ref[e], preferred_element_type=f32)
        h_e = (jax.nn.silu(gu_e[:, :MOE_INTER]) * gu_e[:, MOE_INTER:]).astype(bf16)
        d_e = jnp.dot(h_e, wexp_dn_ref[e], preferred_element_type=f32)
        acc = acc + route_w[:, e:e + 1] * d_e

    out_ref[...] = acc.astype(out_ref.dtype)


# ---------------- host-side parameter prep ----------------
def _rope_permutations(n_heads, head_dim):
    # Per head: layout A = [even channels | odd channels], layout B = half-swap
    # of A.  With these layouts the interleaved rotation becomes
    # q_rot = A*cos + B*sin_signed (no in-kernel shuffles).
    half = head_dim // 2
    pa, pb = [], []
    for h in range(n_heads):
        base = h * head_dim
        pa += [base + 2 * j for j in range(half)]
        pa += [base + 2 * j + 1 for j in range(half)]
        pb += [base + 2 * j + 1 for j in range(half)]
        pb += [base + 2 * j for j in range(half)]
    return jnp.array(pa, jnp.int32), jnp.array(pb, jnp.int32)


def preprocess_params(params):
    """One-time (host-side) rearrangement + bf16 cast of module weights."""
    bf16 = jnp.bfloat16
    w_qkv = params["w_qkv"]
    w_q = w_qkv[:, :Q_SIZE]
    w_k = w_qkv[:, Q_SIZE:Q_SIZE + KV_SIZE]
    w_v = w_qkv[:, Q_SIZE + KV_SIZE:]
    pa_q, pb_q = _rope_permutations(NUM_HEADS, HEAD_DIM)
    pa_k, pb_k = _rope_permutations(NUM_KV_HEADS, HEAD_DIM)
    return {
        "ln1": params["input_ln_w"].reshape(1, HIDDEN),            # f32 (VPU)
        "ln2": params["post_ln_w"].reshape(1, HIDDEN),
        "w_q_a": w_q[:, pa_q].astype(bf16), "w_q_b": w_q[:, pb_q].astype(bf16),
        "w_k_a": w_k[:, pa_k].astype(bf16), "w_k_b": w_k[:, pb_k].astype(bf16),
        "w_v": w_v.astype(bf16),
        "w_o": params["w_o"].astype(bf16),
        "w_gate": params["w_gate"],                                # f32 routing
        "e_bias": params["e_score_bias"].reshape(1, MOE_NUM_EXPERTS),
        "w_sh_gu": params["w_shared_gate_up"].astype(bf16),
        "w_sh_dn": params["w_shared_down"].astype(bf16),
        "w_exp_gu": params["w_experts_gate_up"].astype(bf16),
        "w_exp_dn": params["w_experts_down"].astype(bf16),
    }


def _rope_tables_q(positions):
    # cos table: cos_j at both half-positions; sin table signed (-sin | +sin).
    # Only the q-sized tables are built; the k tables are their first KV_SIZE
    # lanes (the per-head tile repeats).
    inv_freq = 1.0 / (ROPE_THETA ** (
        jnp.arange(0, HEAD_DIM, 2, dtype=jnp.float32) / HEAD_DIM))
    freqs = positions.astype(jnp.float32)[:, None] * inv_freq[None, :]  # (T, D/2)
    cos = jnp.cos(freqs)
    sin = jnp.sin(freqs)
    cos_h = jnp.concatenate([cos, cos], axis=-1)          # (T, D)
    sin_h = jnp.concatenate([-sin, sin], axis=-1)         # (T, D), signed
    return jnp.tile(cos_h, (1, NUM_HEADS)), jnp.tile(sin_h, (1, NUM_HEADS))


def decoder_layer_forward(prep, positions, hidden_states, residual=None):
    t, h = hidden_states.shape
    residual_in = jnp.zeros_like(hidden_states) if residual is None else residual
    cos_q, sin_q = _rope_tables_q(positions)
    # Single grid-less pallas_call: every operand is a whole-array VMEM block.
    # TODO(synk): at real Ernie sizes add a leading "parallel" token-tile grid
    #             axis (dimension_semantics) so v7x's two TensorCores are both
    #             used, and stream expert weights with pl.Buffered block specs
    #             sized against 64 MiB (v7x) / 128 MiB (v5e/v6e) VMEM.
    out, res_out = pl.pallas_call(
        _ernie_moe_decoder_layer_kernel,
        out_shape=(
            jax.ShapeDtypeStruct((t, h), hidden_states.dtype),
            jax.ShapeDtypeStruct((t, h), hidden_states.dtype),
        ),
        scratch_shapes=[pltpu.VMEM((t, Q_SIZE), jnp.float32)],
    )(hidden_states, residual_in, prep["ln1"], prep["ln2"],
      prep["w_q_a"], prep["w_q_b"], prep["w_k_a"], prep["w_k_b"], prep["w_v"],
      prep["w_o"], cos_q, sin_q,
      prep["w_gate"], prep["e_bias"], prep["w_sh_gu"], prep["w_sh_dn"],
      prep["w_exp_gu"], prep["w_exp_dn"])
    return out, res_out


# ---------------- pure-JAX reference (module semantics) ----------------
def _ref_rmsnorm(x, w, eps=RMS_EPS):
    xf = x.astype(jnp.float32)
    var = jnp.mean(xf * xf, axis=-1, keepdims=True)
    return (xf * jax.lax.rsqrt(var + eps) * w.astype(jnp.float32)).astype(x.dtype)


def _ref_rope_interleaved(x, positions):
    t, nh, d = x.shape
    inv_freq = 1.0 / (ROPE_THETA ** (jnp.arange(0, d, 2, dtype=jnp.float32) / d))
    freqs = positions.astype(jnp.float32)[:, None] * inv_freq[None, :]
    cos = jnp.cos(freqs)[:, None, :]
    sin = jnp.sin(freqs)[:, None, :]
    x1 = x[..., 0::2].astype(jnp.float32)
    x2 = x[..., 1::2].astype(jnp.float32)
    o1 = x1 * cos - x2 * sin
    o2 = x2 * cos + x1 * sin
    return jnp.stack([o1, o2], axis=-1).reshape(t, nh, d).astype(x.dtype)


def reference_forward(params, positions, hidden_states, residual=None):
    hp = jax.lax.Precision.HIGHEST
    if residual is None:
        residual = hidden_states
        hidden = _ref_rmsnorm(hidden_states, params["input_ln_w"])
    else:
        residual = hidden_states + residual
        hidden = _ref_rmsnorm(residual, params["input_ln_w"])
    qkv = jnp.dot(hidden, params["w_qkv"], precision=hp)
    q = qkv[:, :Q_SIZE].reshape(SEQ, NUM_HEADS, HEAD_DIM)
    k = qkv[:, Q_SIZE:Q_SIZE + KV_SIZE].reshape(SEQ, NUM_KV_HEADS, HEAD_DIM)
    v = qkv[:, Q_SIZE + KV_SIZE:].reshape(SEQ, NUM_KV_HEADS, HEAD_DIM)
    q = _ref_rope_interleaved(q, positions)
    k = _ref_rope_interleaved(k, positions)
    group = NUM_HEADS // NUM_KV_HEADS
    kq = jnp.repeat(k, group, axis=1)
    vq = jnp.repeat(v, group, axis=1)
    scores = jnp.einsum("qhd,khd->hqk", q, kq, precision=hp) * SCALE
    mask = jnp.tril(jnp.ones((SEQ, SEQ), bool))
    scores = jnp.where(mask[None], scores, -1e30)
    p = jax.nn.softmax(scores, axis=-1)
    attn = jnp.einsum("hqk,khd->qhd", p, vq, precision=hp).reshape(SEQ, Q_SIZE)
    attn_o = jnp.dot(attn, params["w_o"], precision=hp)
    residual = attn_o + residual
    hidden = _ref_rmsnorm(residual, params["post_ln_w"])
    gu = jnp.dot(hidden, params["w_shared_gate_up"], precision=hp)
    out = jnp.dot(jax.nn.silu(gu[:, :SHARED_INTER]) * gu[:, SHARED_INTER:],
                  params["w_shared_down"], precision=hp)
    logits = jnp.dot(hidden, params["w_gate"], precision=hp)
    probs = jax.nn.softmax(logits.astype(jnp.float32), axis=-1)
    corrected = probs + params["e_score_bias"][None, :]
    _, topk_idx = jax.lax.top_k(corrected, MOE_K)
    topk_w = jnp.take_along_axis(probs, topk_idx, axis=-1)
    topk_w = topk_w / jnp.sum(topk_w, axis=-1, keepdims=True)
    dense = jnp.zeros_like(probs).at[jnp.arange(SEQ)[:, None], topk_idx].set(topk_w)
    for e in range(MOE_NUM_EXPERTS):
        gu_e = jnp.dot(hidden, params["w_experts_gate_up"][e], precision=hp)
        h_e = jax.nn.silu(gu_e[:, :MOE_INTER]) * gu_e[:, MOE_INTER:]
        d_e = jnp.dot(h_e, params["w_experts_down"][e], precision=hp)
        out = out + dense[:, e:e + 1] * d_e
    return out, residual


# ---------------- params ----------------
def init_params(key):
    ks = jax.random.split(key, 10)
    s = 0.02
    p = {}
    p["input_ln_w"] = 1.0 + 0.01 * jax.random.normal(ks[0], (HIDDEN,), jnp.float32)
    p["post_ln_w"] = 1.0 + 0.01 * jax.random.normal(ks[1], (HIDDEN,), jnp.float32)
    p["w_qkv"] = s * jax.random.normal(ks[2], (HIDDEN, Q_SIZE + 2 * KV_SIZE), jnp.float32)
    p["w_o"] = s * jax.random.normal(ks[3], (Q_SIZE, HIDDEN), jnp.float32)
    p["w_gate"] = s * jax.random.normal(ks[4], (HIDDEN, MOE_NUM_EXPERTS), jnp.float32)
    p["e_score_bias"] = 0.1 * jax.random.normal(ks[5], (MOE_NUM_EXPERTS,), jnp.float32)
    p["w_experts_gate_up"] = s * jax.random.normal(
        ks[6], (MOE_NUM_EXPERTS, HIDDEN, 2 * MOE_INTER), jnp.float32)
    p["w_experts_down"] = s * jax.random.normal(
        ks[7], (MOE_NUM_EXPERTS, MOE_INTER, HIDDEN), jnp.float32)
    p["w_shared_gate_up"] = s * jax.random.normal(
        ks[8], (HIDDEN, 2 * SHARED_INTER), jnp.float32)
    p["w_shared_down"] = s * jax.random.normal(
        ks[9], (SHARED_INTER, HIDDEN), jnp.float32)
    return p


if __name__ == "__main__":
    key = jax.random.PRNGKey(0)
    pkey, xkey = jax.random.split(key)
    params = init_params(pkey)
    prep = preprocess_params(params)
    positions = jnp.arange(SEQ, dtype=jnp.int32)
    hidden_states = jax.random.normal(xkey, (SEQ, HIDDEN), jnp.float32)

    fwd = jax.jit(decoder_layer_forward)
    out, residual = fwd(prep, positions, hidden_states, None)
    jax.block_until_ready(out)
    jax.block_until_ready(residual)

    assert out.shape == (SEQ, HIDDEN) and residual.shape == (SEQ, HIDDEN)
    assert bool(jnp.isfinite(out).all()) and bool(jnp.isfinite(residual).all())

    # Loose sanity check against a pure-JAX f32 reference of the module
    # semantics (tolerance absorbs the bf16 MXU inputs + approx reciprocal).
    ref_out, ref_res = reference_forward(params, positions, hidden_states, None)
    err_o = float(jnp.max(jnp.abs(out - ref_out)))
    err_r = float(jnp.max(jnp.abs(residual - ref_res)))
    tol_o = 5e-3 + 5e-2 * float(jnp.max(jnp.abs(ref_out)))
    tol_r = 5e-3 + 5e-2 * float(jnp.max(jnp.abs(ref_res)))
    assert err_o <= tol_o, f"output mismatch: {err_o} > {tol_o}"
    assert err_r <= tol_r, f"residual mismatch: {err_r} > {tol_r}"

    print("KERNEL_OK")
</pallas_src>

<mosaic_0001>
module attributes {stable_mosaic.version = 11 : i64} {
  func.func @_ernie_moe_decoder_layer_kernel(%arg0: memref<8x128xf32, #tpu.memory_space<vmem>>, %arg1: memref<8x128xf32, #tpu.memory_space<vmem>>, %arg2: memref<1x128xf32, #tpu.memory_space<vmem>>, %arg3: memref<1x128xf32, #tpu.memory_space<vmem>>, %arg4: memref<128x128xbf16, #tpu.memory_space<vmem>>, %arg5: memref<128x128xbf16, #tpu.memory_space<vmem>>, %arg6: memref<128x64xbf16, #tpu.memory_space<vmem>>, %arg7: memref<128x64xbf16, #tpu.memory_space<vmem>>, %arg8: memref<128x64xbf16, #tpu.memory_space<vmem>>, %arg9: memref<128x128xbf16, #tpu.memory_space<vmem>>, %arg10: memref<8x128xf32, #tpu.memory_space<vmem>>, %arg11: memref<8x128xf32, #tpu.memory_space<vmem>>, %arg12: memref<128x4xf32, #tpu.memory_space<vmem>>, %arg13: memref<1x4xf32, #tpu.memory_space<vmem>>, %arg14: memref<128x128xbf16, #tpu.memory_space<vmem>>, %arg15: memref<64x128xbf16, #tpu.memory_space<vmem>>, %arg16: memref<4x128x128xbf16, #tpu.memory_space<vmem>>, %arg17: memref<4x64x128xbf16, #tpu.memory_space<vmem>>, %arg18: memref<8x128xf32, #tpu.memory_space<vmem>>, %arg19: memref<8x128xf32, #tpu.memory_space<vmem>>, %arg20: memref<8x128xf32, #tpu.memory_space<vmem>>) attributes {dimension_semantics = [], scalar_prefetch = 0 : i64, scratch_operands = 1 : i64, tpu.core_type = #tpu.core_type<tc>} {
    %c0 = arith.constant 0 : index
    %c0_0 = arith.constant 0 : index
    %0 = vector.load %arg0[%c0, %c0_0] : memref<8x128xf32, #tpu.memory_space<vmem>>, vector<8x128xf32>
    %c0_1 = arith.constant 0 : index
    %c0_2 = arith.constant 0 : index
    %1 = vector.load %arg1[%c0_1, %c0_2] : memref<8x128xf32, #tpu.memory_space<vmem>>, vector<8x128xf32>
    %2 = arith.addf %0, %1 : vector<8x128xf32>
    %3 = arith.mulf %2, %2 : vector<8x128xf32>
    %cst = arith.constant dense<0.000000e+00> : vector<8xf32>
    %4 = vector.multi_reduction <add>, %3, %cst [1] : vector<8x128xf32> to vector<8xf32>
    %5 = vector.shape_cast %4 : vector<8xf32> to vector<8x1xf32>
    %cst_3 = arith.constant 1.280000e+02 : f32
    %6 = vector.broadcast %cst_3 : f32 to vector<8x1xf32>
    %7 = arith.divf %5, %6 : vector<8x1xf32>
    %cst_4 = arith.constant 9.99999974E-6 : f32
    %8 = vector.broadcast %cst_4 : f32 to vector<8x1xf32>
    %9 = arith.addf %7, %8 : vector<8x1xf32>
    %10 = math.rsqrt %9 : vector<8x1xf32>
    %11 = vector.broadcast %10 : vector<8x1xf32> to vector<8x128xf32>
    %12 = arith.mulf %2, %11 : vector<8x128xf32>
    %c0_5 = arith.constant 0 : index
    %c0_6 = arith.constant 0 : index
    %13 = vector.load %arg2[%c0_5, %c0_6] : memref<1x128xf32, #tpu.memory_space<vmem>>, vector<1x128xf32>
    %14 = vector.broadcast %13 : vector<1x128xf32> to vector<8x128xf32>
    %15 = arith.mulf %12, %14 : vector<8x128xf32>
    %16 = arith.truncf %15 : vector<8x128xf32> to vector<8x128xbf16>
    %c0_7 = arith.constant 0 : index
    %c0_8 = arith.constant 0 : index
    %17 = vector.load %arg10[%c0_7, %c0_8] : memref<8x128xf32, #tpu.memory_space<vmem>>, vector<8x128xf32>
    %c0_9 = arith.constant 0 : index
    %c0_10 = arith.constant 0 : index
    %18 = vector.load %arg11[%c0_9, %c0_10] : memref<8x128xf32, #tpu.memory_space<vmem>>, vector<8x128xf32>
    %19 = vector.extract_strided_slice %17 {offsets = [0, 0], sizes = [8, 64], strides = [1, 1]} : vector<8x128xf32> to vector<8x64xf32>
    %20 = vector.extract_strided_slice %18 {offsets = [0, 0], sizes = [8, 64], strides = [1, 1]} : vector<8x128xf32> to vector<8x64xf32>
    %c0_11 = arith.constant 0 : index
    %c0_12 = arith.constant 0 : index
    %21 = vector.load %arg4[%c0_11, %c0_12] : memref<128x128xbf16, #tpu.memory_space<vmem>>, vector<128x128xbf16>
    %cst_13 = arith.constant dense<0.000000e+00> : vector<8x128xf32>
    %22 = tpu.matmul %16, %21, %cst_13 {dimension_numbers = #tpu.dot_dimension_numbers<[1], [0], [0], [1], [0, 0, 1, 1], [], []>} : vector<8x128xbf16>, vector<128x128xbf16>, vector<8x128xf32> -> vector<8x128xf32>
    %23 = arith.mulf %22, %17 : vector<8x128xf32>
    %c0_14 = arith.constant 0 : index
    %c0_15 = arith.constant 0 : index
    %24 = vector.load %arg5[%c0_14, %c0_15] : memref<128x128xbf16, #tpu.memory_space<vmem>>, vector<128x128xbf16>
    %cst_16 = arith.constant dense<0.000000e+00> : vector<8x128xf32>
    %25 = tpu.matmul %16, %24, %cst_16 {dimension_numbers = #tpu.dot_dimension_numbers<[1], [0], [0], [1], [0, 0, 1, 1], [], []>} : vector<8x128xbf16>, vector<128x128xbf16>, vector<8x128xf32> -> vector<8x128xf32>
    %26 = arith.mulf %25, %18 : vector<8x128xf32>
    %27 = arith.addf %23, %26 : vector<8x128xf32>
    %c0_17 = arith.constant 0 : index
    %c0_18 = arith.constant 0 : index
    %28 = vector.load %arg6[%c0_17, %c0_18] : memref<128x64xbf16, #tpu.memory_space<vmem>>, vector<128x64xbf16>
    %cst_19 = arith.constant dense<0.000000e+00> : vector<8x64xf32>
    %29 = tpu.matmul %16, %28, %cst_19 {dimension_numbers = #tpu.dot_dimension_numbers<[1], [0], [0], [1], [0, 0, 1, 1], [], []>} : vector<8x128xbf16>, vector<128x64xbf16>, vector<8x64xf32> -> vector<8x64xf32>
    %30 = arith.mulf %29, %19 : vector<8x64xf32>
    %c0_20 = arith.constant 0 : index
    %c0_21 = arith.constant 0 : index
    %31 = vector.load %arg7[%c0_20, %c0_21] : memref<128x64xbf16, #tpu.memory_space<vmem>>, vector<128x64xbf16>
    %cst_22 = arith.constant dense<0.000000e+00> : vector<8x64xf32>
    %32 = tpu.matmul %16, %31, %cst_22 {dimension_numbers = #tpu.dot_dimension_numbers<[1], [0], [0], [1], [0, 0, 1, 1], [], []>} : vector<8x128xbf16>, vector<128x64xbf16>, vector<8x64xf32> -> vector<8x64xf32>
    %33 = arith.mulf %32, %20 : vector<8x64xf32>
    %34 = arith.addf %30, %33 : vector<8x64xf32>
    %c0_23 = arith.constant 0 : index
    %c0_24 = arith.constant 0 : index
    %35 = vector.load %arg8[%c0_23, %c0_24] : memref<128x64xbf16, #tpu.memory_space<vmem>>, vector<128x64xbf16>
    %cst_25 = arith.constant dense<0.000000e+00> : vector<8x64xf32>
    %36 = tpu.matmul %16, %35, %cst_25 {dimension_numbers = #tpu.dot_dimension_numbers<[1], [0], [0], [1], [0, 0, 1, 1], [], []>} : vector<8x128xbf16>, vector<128x64xbf16>, vector<8x64xf32> -> vector<8x64xf32>
    %37 = tpu.iota {dimensions = array<i32: 0>} : vector<8x8xi32>
    %38 = tpu.iota {dimensions = array<i32: 1>} : vector<8x8xi32>
    %39 = arith.cmpi sle, %38, %37 : vector<8x8xi32>
    %40 = vector.extract_strided_slice %27 {offsets = [0, 0], sizes = [8, 32], strides = [1, 1]} : vector<8x128xf32> to vector<8x32xf32>
    %41 = vector.extract_strided_slice %27 {offsets = [0, 32], sizes = [8, 32], strides = [1, 1]} : vector<8x128xf32> to vector<8x32xf32>
    %42 = vector.extract_strided_slice %27 {offsets = [0, 64], sizes = [8, 32], strides = [1, 1]} : vector<8x128xf32> to vector<8x32xf32>
    %43 = vector.extract_strided_slice %27 {offsets = [0, 96], sizes = [8, 32], strides = [1, 1]} : vector<8x128xf32> to vector<8x32xf32>
    %44 = vector.shape_cast %40 : vector<8x32xf32> to vector<1x8x32xf32>
    %45 = vector.shape_cast %41 : vector<8x32xf32> to vector<1x8x32xf32>
    %46 = vector.shape_cast %42 : vector<8x32xf32> to vector<1x8x32xf32>
    %47 = vector.shape_cast %43 : vector<8x32xf32> to vector<1x8x32xf32>
    %48 = tpu.concatenate %44, %45, %46, %47 in 0 : vector<1x8x32xf32>, vector<1x8x32xf32>, vector<1x8x32xf32>, vector<1x8x32xf32> -> vector<4x8x32xf32>
    %49 = arith.truncf %48 : vector<4x8x32xf32> to vector<4x8x32xbf16>
    %50 = vector.extract_strided_slice %34 {offsets = [0, 0], sizes = [8, 32], strides = [1, 1]} : vector<8x64xf32> to vector<8x32xf32>
    %51 = vector.extract_strided_slice %34 {offsets = [0, 0], sizes = [8, 32], strides = [1, 1]} : vector<8x64xf32> to vector<8x32xf32>
    %52 = vector.extract_strided_slice %34 {offsets = [0, 32], sizes = [8, 32], strides = [1, 1]} : vector<8x64xf32> to vector<8x32xf32>
    %53 = vector.extract_strided_slice %34 {offsets = [0, 32], sizes = [8, 32], strides = [1, 1]} : vector<8x64xf32> to vector<8x32xf32>
    %54 = vector.shape_cast %50 : vector<8x32xf32> to vector<1x8x32xf32>
    %55 = vector.shape_cast %51 : vector<8x32xf32> to vector<1x8x32xf32>
    %56 = vector.shape_cast %52 : vector<8x32xf32> to vector<1x8x32xf32>
    %57 = vector.shape_cast %53 : vector<8x32xf32> to vector<1x8x32xf32>
    %58 = tpu.concatenate %54, %55, %56, %57 in 0 : vector<1x8x32xf32>, vector<1x8x32xf32>, vector<1x8x32xf32>, vector<1x8x32xf32> -> vector<4x8x32xf32>
    %59 = arith.truncf %58 : vector<4x8x32xf32> to vector<4x8x32xbf16>
    %60 = vector.extract_strided_slice %36 {offsets = [0, 0], sizes = [8, 32], strides = [1, 1]} : vector<8x64xf32> to vector<8x32xf32>
    %61 = vector.extract_strided_slice %36 {offsets = [0, 0], sizes = [8, 32], strides = [1, 1]} : vector<8x64xf32> to vector<8x32xf32>
    %62 = vector.extract_strided_slice %36 {offsets = [0, 32], sizes = [8, 32], strides = [1, 1]} : vector<8x64xf32> to vector<8x32xf32>
    %63 = vector.extract_strided_slice %36 {offsets = [0, 32], sizes = [8, 32], strides = [1, 1]} : vector<8x64xf32> to vector<8x32xf32>
    %64 = vector.shape_cast %60 : vector<8x32xf32> to vector<1x8x32xf32>
    %65 = vector.shape_cast %61 : vector<8x32xf32> to vector<1x8x32xf32>
    %66 = vector.shape_cast %62 : vector<8x32xf32> to vector<1x8x32xf32>
    %67 = vector.shape_cast %63 : vector<8x32xf32> to vector<1x8x32xf32>
    %68 = tpu.concatenate %64, %65, %66, %67 in 0 : vector<1x8x32xf32>, vector<1x8x32xf32>, vector<1x8x32xf32>, vector<1x8x32xf32> -> vector<4x8x32xf32>
    %69 = arith.truncf %68 : vector<4x8x32xf32> to vector<4x8x32xbf16>
    "tpu.trace_start"() <{level = 10 : i32, message = "hqd,hkd->hqk"}> : () -> ()
    %cst_26 = arith.constant dense<0.000000e+00> : vector<4x8x8xf32>
    %70 = tpu.matmul %49, %59, %cst_26 {dimension_numbers = #tpu.dot_dimension_numbers<[2], [2], [1], [1], [0, 0, 0, 1, 1, 1], [0], [0]>} : vector<4x8x32xbf16>, vector<4x8x32xbf16>, vector<4x8x8xf32> -> vector<4x8x8xf32>
    "tpu.trace_stop"() : () -> ()
    %cst_27 = arith.constant 0.176776692 : f32
    %71 = vector.broadcast %cst_27 : f32 to vector<4x8x8xf32>
    %72 = arith.mulf %70, %71 : vector<4x8x8xf32>
    %73 = vector.shape_cast %39 : vector<8x8xi1> to vector<1x8x8xi1>
    %cst_28 = arith.constant -1.000000e+30 : f32
    %74 = vector.shape_cast %73 : vector<1x8x8xi1> to vector<1x8x8xi1>
    %75 = vector.broadcast %74 : vector<1x8x8xi1> to vector<4x8x8xi1>
    %76 = vector.broadcast %cst_28 : f32 to vector<4x8x8xf32>
    %77 = arith.select %75, %72, %76 : vector<4x8x8xi1>, vector<4x8x8xf32>
    %cst_29 = arith.constant dense<0xFF800000> : vector<4x8xf32>
    %78 = vector.multi_reduction <maximumf>, %77, %cst_29 [2] : vector<4x8x8xf32> to vector<4x8xf32>
    %79 = vector.shape_cast %78 : vector<4x8xf32> to vector<4x8x1xf32>
    %80 = vector.broadcast %79 : vector<4x8x1xf32> to vector<4x8x8xf32>
    %81 = arith.subf %77, %80 : vector<4x8x8xf32>
    %82 = math.exp %81 : vector<4x8x8xf32>
    %cst_30 = arith.constant dense<0.000000e+00> : vector<4x8xf32>
    %83 = vector.multi_reduction <add>, %82, %cst_30 [2] : vector<4x8x8xf32> to vector<4x8xf32>
    %84 = vector.shape_cast %83 : vector<4x8xf32> to vector<4x8x1xf32>
    %85 = tpu.reciprocal %84 {approx = true} : vector<4x8x1xf32> -> vector<4x8x1xf32>
    %86 = vector.broadcast %85 : vector<4x8x1xf32> to vector<4x8x8xf32>
    %87 = arith.mulf %82, %86 : vector<4x8x8xf32>
    %88 = arith.truncf %87 : vector<4x8x8xf32> to vector<4x8x8xbf16>
    "tpu.trace_start"() <{level = 10 : i32, message = "hqk,hkd->hqd"}> : () -> ()
    %cst_31 = arith.constant dense<0.000000e+00> : vector<4x8x32xf32>
    %89 = tpu.matmul %88, %69, %cst_31 {dimension_numbers = #tpu.dot_dimension_numbers<[2], [1], [1], [2], [0, 0, 0, 1, 1, 2], [0], [0]>} : vector<4x8x8xbf16>, vector<4x8x32xbf16>, vector<4x8x32xf32> -> vector<4x8x32xf32>
    "tpu.trace_stop"() : () -> ()
    %90 = vector.extract_strided_slice %89 {offsets = [0, 0, 0], sizes = [1, 8, 32], strides = [1, 1, 1]} : vector<4x8x32xf32> to vector<1x8x32xf32>
    %91 = vector.shape_cast %90 : vector<1x8x32xf32> to vector<8x32xf32>
    %c0_32 = arith.constant 0 : index
    %c0_33 = arith.constant 0 : index
    %92 = vector.load %arg20[%c0_32, %c0_33] : memref<8x128xf32, #tpu.memory_space<vmem>>, vector<8x32xf32>
    tpu.vector_store %arg20[%c0_32, %c0_33], %91 {strides = array<i32>} : memref<8x128xf32, #tpu.memory_space<vmem>>, vector<8x32xf32>,
    %93 = vector.extract_strided_slice %89 {offsets = [1, 0, 0], sizes = [1, 8, 32], strides = [1, 1, 1]} : vector<4x8x32xf32> to vector<1x8x32xf32>
    %94 = vector.shape_cast %93 : vector<1x8x32xf32> to vector<8x32xf32>
    %c0_34 = arith.constant 0 : index
    %c32 = arith.constant 32 : index
    %95 = vector.load %arg20[%c0_34, %c32] : memref<8x128xf32, #tpu.memory_space<vmem>>, vector<8x32xf32>
    tpu.vector_store %arg20[%c0_34, %c32], %94 {strides = array<i32>} : memref<8x128xf32, #tpu.memory_space<vmem>>, vector<8x32xf32>,
    %96 = vector.extract_strided_slice %89 {offsets = [2, 0, 0], sizes = [1, 8, 32], strides = [1, 1, 1]} : vector<4x8x32xf32> to vector<1x8x32xf32>
    %97 = vector.shape_cast %96 : vector<1x8x32xf32> to vector<8x32xf32>
    %c0_35 = arith.constant 0 : index
    %c64 = arith.constant 64 : index
    %98 = vector.load %arg20[%c0_35, %c64] : memref<8x128xf32, #tpu.memory_space<vmem>>, vector<8x32xf32>
    tpu.vector_store %arg20[%c0_35, %c64], %97 {strides = array<i32>} : memref<8x128xf32, #tpu.memory_space<vmem>>, vector<8x32xf32>,
    %99 = vector.extract_strided_slice %89 {offsets = [3, 0, 0], sizes = [1, 8, 32], strides = [1, 1, 1]} : vector<4x8x32xf32> to vector<1x8x32xf32>
    %100 = vector.shape_cast %99 : vector<1x8x32xf32> to vector<8x32xf32>
    %c0_36 = arith.constant 0 : index
    %c96 = arith.constant 96 : index
    %101 = vector.load %arg20[%c0_36, %c96] : memref<8x128xf32, #tpu.memory_space<vmem>>, vector<8x32xf32>
    tpu.vector_store %arg20[%c0_36, %c96], %100 {strides = array<i32>} : memref<8x128xf32, #tpu.memory_space<vmem>>, vector<8x32xf32>,
    %c0_37 = arith.constant 0 : index
    %c0_38 = arith.constant 0 : index
    %102 = vector.load %arg20[%c0_37, %c0_38] : memref<8x128xf32, #tpu.memory_space<vmem>>, vector<8x128xf32>
    %103 = arith.truncf %102 : vector<8x128xf32> to vector<8x128xbf16>
    %c0_39 = arith.constant 0 : index
    %c0_40 = arith.constant 0 : index
    %104 = vector.load %arg9[%c0_39, %c0_40] : memref<128x128xbf16, #tpu.memory_space<vmem>>, vector<128x128xbf16>
    %cst_41 = arith.constant dense<0.000000e+00> : vector<8x128xf32>
    %105 = tpu.matmul %103, %104, %cst_41 {dimension_numbers = #tpu.dot_dimension_numbers<[1], [0], [0], [1], [0, 0, 1, 1], [], []>} : vector<8x128xbf16>, vector<128x128xbf16>, vector<8x128xf32> -> vector<8x128xf32>
    %106 = arith.addf %105, %2 : vector<8x128xf32>
    %c0_42 = arith.constant 0 : index
    %c0_43 = arith.constant 0 : index
    %107 = vector.load %arg19[%c0_42, %c0_43] : memref<8x128xf32, #tpu.memory_space<vmem>>, vector<8x128xf32>
    tpu.vector_store %arg19[%c0_42, %c0_43], %106 {strides = array<i32>} : memref<8x128xf32, #tpu.memory_space<vmem>>, vector<8x128xf32>,
    %108 = arith.mulf %106, %106 : vector<8x128xf32>
    %cst_44 = arith.constant dense<0.000000e+00> : vector<8xf32>
    %109 = vector.multi_reduction <add>, %108, %cst_44 [1] : vector<8x128xf32> to vector<8xf32>
    %110 = vector.shape_cast %109 : vector<8xf32> to vector<8x1xf32>
    %cst_45 = arith.constant 1.280000e+02 : f32
    %111 = vector.broadcast %cst_45 : f32 to vector<8x1xf32>
    %112 = arith.divf %110, %111 : vector<8x1xf32>
    %cst_46 = arith.constant 9.99999974E-6 : f32
    %113 = vector.broadcast %cst_46 : f32 to vector<8x1xf32>
    %114 = arith.addf %112, %113 : vector<8x1xf32>
    %115 = math.rsqrt %114 : vector<8x1xf32>
    %116 = vector.broadcast %115 : vector<8x1xf32> to vector<8x128xf32>
    %117 = arith.mulf %106, %116 : vector<8x128xf32>
    %c0_47 = arith.constant 0 : index
    %c0_48 = arith.constant 0 : index
    %118 = vector.load %arg3[%c0_47, %c0_48] : memref<1x128xf32, #tpu.memory_space<vmem>>, vector<1x128xf32>
    %119 = vector.broadcast %118 : vector<1x128xf32> to vector<8x128xf32>
    %120 = arith.mulf %117, %119 : vector<8x128xf32>
    %121 = arith.truncf %120 : vector<8x128xf32> to vector<8x128xbf16>
    %c0_49 = arith.constant 0 : index
    %c0_50 = arith.constant 0 : index
    %122 = vector.load %arg14[%c0_49, %c0_50] : memref<128x128xbf16, #tpu.memory_space<vmem>>, vector<128x128xbf16>
    %cst_51 = arith.constant dense<0.000000e+00> : vector<8x128xf32>
    %123 = tpu.matmul %121, %122, %cst_51 {dimension_numbers = #tpu.dot_dimension_numbers<[1], [0], [0], [1], [0, 0, 1, 1], [], []>} : vector<8x128xbf16>, vector<128x128xbf16>, vector<8x128xf32> -> vector<8x128xf32>
    %124 = vector.extract_strided_slice %123 {offsets = [0, 0], sizes = [8, 64], strides = [1, 1]} : vector<8x128xf32> to vector<8x64xf32>
    %125 = arith.negf %124 : vector<8x64xf32>
    %126 = math.exp %125 : vector<8x64xf32>
    %cst_52 = arith.constant 1.000000e+00 : f32
    %127 = vector.broadcast %cst_52 : f32 to vector<8x64xf32>
    %128 = arith.addf %127, %126 : vector<8x64xf32>
    %129 = arith.divf %127, %128 : vector<8x64xf32>
    %130 = arith.mulf %124, %129 : vector<8x64xf32>
    %131 = vector.extract_strided_slice %123 {offsets = [0, 64], sizes = [8, 64], strides = [1, 1]} : vector<8x128xf32> to vector<8x64xf32>
    %132 = arith.mulf %130, %131 : vector<8x64xf32>
    %133 = arith.truncf %132 : vector<8x64xf32> to vector<8x64xbf16>
    %c0_53 = arith.constant 0 : index
    %c0_54 = arith.constant 0 : index
    %134 = vector.load %arg15[%c0_53, %c0_54] : memref<64x128xbf16, #tpu.memory_space<vmem>>, vector<64x128xbf16>
    %cst_55 = arith.constant dense<0.000000e+00> : vector<8x128xf32>
    %135 = tpu.matmul %133, %134, %cst_55 {dimension_numbers = #tpu.dot_dimension_numbers<[1], [0], [0], [1], [0, 0, 1, 1], [], []>} : vector<8x64xbf16>, vector<64x128xbf16>, vector<8x128xf32> -> vector<8x128xf32>
    %c0_56 = arith.constant 0 : index
    %c0_57 = arith.constant 0 : index
    %136 = vector.load %arg12[%c0_56, %c0_57] : memref<128x4xf32, #tpu.memory_space<vmem>>, vector<128x4xf32>
    %cst_58 = arith.constant dense<0.000000e+00> : vector<8x4xf32>
    %137 = tpu.matmul %120, %136, %cst_58 {dimension_numbers = #tpu.dot_dimension_numbers<[1], [0], [0], [1], [0, 0, 1, 1], [], []>} : vector<8x128xf32>, vector<128x4xf32>, vector<8x4xf32> -> vector<8x4xf32>
    %cst_59 = arith.constant dense<0xFF800000> : vector<8xf32>
    %138 = vector.multi_reduction <maximumf>, %137, %cst_59 [1] : vector<8x4xf32> to vector<8xf32>
    %139 = vector.shape_cast %138 : vector<8xf32> to vector<8x1xf32>
    %140 = vector.broadcast %139 : vector<8x1xf32> to vector<8x4xf32>
    %141 = arith.subf %137, %140 : vector<8x4xf32>
    %142 = math.exp %141 : vector<8x4xf32>
    %cst_60 = arith.constant dense<0.000000e+00> : vector<8xf32>
    %143 = vector.multi_reduction <add>, %142, %cst_60 [1] : vector<8x4xf32> to vector<8xf32>
    %144 = vector.shape_cast %143 : vector<8xf32> to vector<8x1xf32>
    %145 = vector.broadcast %144 : vector<8x1xf32> to vector<8x4xf32>
    %146 = arith.divf %142, %145 : vector<8x4xf32>
    %c0_61 = arith.constant 0 : index
    %c0_62 = arith.constant 0 : index
    %147 = vector.load %arg13[%c0_61, %c0_62] : memref<1x4xf32, #tpu.memory_space<vmem>>, vector<1x4xf32>
    %148 = vector.broadcast %147 : vector<1x4xf32> to vector<8x4xf32>
    %149 = arith.addf %146, %148 : vector<8x4xf32>
    %150 = tpu.iota {dimensions = array<i32: 1>} : vector<8x4xi32>
    %false = arith.constant false
    %151 = vector.broadcast %false : i1 to vector<8x4xi1>
    %cst_63 = arith.constant dense<0xFF800000> : vector<8xf32>
    %152 = vector.multi_reduction <maximumf>, %149, %cst_63 [1] : vector<8x4xf32> to vector<8xf32>
    %153 = vector.shape_cast %152 : vector<8xf32> to vector<8x1xf32>
    %154 = vector.broadcast %153 : vector<8x1xf32> to vector<8x4xf32>
    %155 = arith.cmpf oeq, %149, %154 : vector<8x4xf32>
    %c4_i32 = arith.constant 4 : i32
    %156 = vector.broadcast %c4_i32 : i32 to vector<8x4xi32>
    %157 = arith.select %155, %150, %156 : vector<8x4xi1>, vector<8x4xi32>
    %cst_64 = arith.constant dense<2147483647> : vector<8xi32>
    %158 = vector.multi_reduction <minsi>, %157, %cst_64 [1] : vector<8x4xi32> to vector<8xi32>
    %159 = vector.shape_cast %158 : vector<8xi32> to vector<8x1xi32>
    %160 = vector.broadcast %159 : vector<8x1xi32> to vector<8x4xi32>
    %161 = arith.cmpi eq, %150, %160 : vector<8x4xi32>
    %162 = arith.ori %151, %161 : vector<8x4xi1>
    %cst_65 = arith.constant -1.000000e+30 : f32
    %163 = vector.broadcast %cst_65 : f32 to vector<8x4xf32>
    %164 = arith.select %161, %163, %149 : vector<8x4xi1>, vector<8x4xf32>
    %cst_66 = arith.constant dense<0xFF800000> : vector<8xf32>
    %165 = vector.multi_reduction <maximumf>, %164, %cst_66 [1] : vector<8x4xf32> to vector<8xf32>
    %166 = vector.shape_cast %165 : vector<8xf32> to vector<8x1xf32>
    %167 = vector.broadcast %166 : vector<8x1xf32> to vector<8x4xf32>
    %168 = arith.cmpf oeq, %164, %167 : vector<8x4xf32>
    %c4_i32_67 = arith.constant 4 : i32
    %169 = vector.broadcast %c4_i32_67 : i32 to vector<8x4xi32>
    %170 = arith.select %168, %150, %169 : vector<8x4xi1>, vector<8x4xi32>
    %cst_68 = arith.constant dense<2147483647> : vector<8xi32>
    %171 = vector.multi_reduction <minsi>, %170, %cst_68 [1] : vector<8x4xi32> to vector<8xi32>
    %172 = vector.shape_cast %171 : vector<8xi32> to vector<8x1xi32>
    %173 = vector.broadcast %172 : vector<8x1xi32> to vector<8x4xi32>
    %174 = arith.cmpi eq, %150, %173 : vector<8x4xi32>
    %175 = arith.ori %162, %174 : vector<8x4xi1>
    %cst_69 = arith.constant 0.000000e+00 : f32
    %176 = vector.broadcast %cst_69 : f32 to vector<8x4xf32>
    %177 = arith.select %175, %146, %176 : vector<8x4xi1>, vector<8x4xf32>
    %cst_70 = arith.constant dense<0.000000e+00> : vector<8xf32>
    %178 = vector.multi_reduction <add>, %177, %cst_70 [1] : vector<8x4xf32> to vector<8xf32>
    %179 = vector.shape_cast %178 : vector<8xf32> to vector<8x1xf32>
    %180 = vector.broadcast %179 : vector<8x1xf32> to vector<8x4xf32>
    %181 = arith.divf %177, %180 : vector<8x4xf32>
    %c0_71 = arith.constant 0 : index
    %c0_72 = arith.constant 0 : index
    %c0_73 = arith.constant 0 : index
    %182 = vector.load %arg16[%c0_71, %c0_72, %c0_73] : memref<4x128x128xbf16, #tpu.memory_space<vmem>>, vector<1x128x128xbf16>
    %183 = vector.shape_cast %182 : vector<1x128x128xbf16> to vector<128x128xbf16>
    %cst_74 = arith.constant dense<0.000000e+00> : vector<8x128xf32>
    %184 = tpu.matmul %121, %183, %cst_74 {dimension_numbers = #tpu.dot_dimension_numbers<[1], [0], [0], [1], [0, 0, 1, 1], [], []>} : vector<8x128xbf16>, vector<128x128xbf16>, vector<8x128xf32> -> vector<8x128xf32>
    %185 = vector.extract_strided_slice %184 {offsets = [0, 0], sizes = [8, 64], strides = [1, 1]} : vector<8x128xf32> to vector<8x64xf32>
    %186 = arith.negf %185 : vector<8x64xf32>
    %187 = math.exp %186 : vector<8x64xf32>
    %cst_75 = arith.constant 1.000000e+00 : f32
    %188 = vector.broadcast %cst_75 : f32 to vector<8x64xf32>
    %189 = arith.addf %188, %187 : vector<8x64xf32>
    %190 = arith.divf %188, %189 : vector<8x64xf32>
    %191 = arith.mulf %185, %190 : vector<8x64xf32>
    %192 = vector.extract_strided_slice %184 {offsets = [0, 64], sizes = [8, 64], strides = [1, 1]} : vector<8x128xf32> to vector<8x64xf32>
    %193 = arith.mulf %191, %192 : vector<8x64xf32>
    %194 = arith.truncf %193 : vector<8x64xf32> to vector<8x64xbf16>
    %c0_76 = arith.constant 0 : index
    %c0_77 = arith.constant 0 : index
    %c0_78 = arith.constant 0 : index
    %195 = vector.load %arg17[%c0_76, %c0_77, %c0_78] : memref<4x64x128xbf16, #tpu.memory_space<vmem>>, vector<1x64x128xbf16>
    %196 = vector.shape_cast %195 : vector<1x64x128xbf16> to vector<64x128xbf16>
    %cst_79 = arith.constant dense<0.000000e+00> : vector<8x128xf32>
    %197 = tpu.matmul %194, %196, %cst_79 {dimension_numbers = #tpu.dot_dimension_numbers<[1], [0], [0], [1], [0, 0, 1, 1], [], []>} : vector<8x64xbf16>, vector<64x128xbf16>, vector<8x128xf32> -> vector<8x128xf32>
    %198 = vector.extract_strided_slice %181 {offsets = [0, 0], sizes = [8, 1], strides = [1, 1]} : vector<8x4xf32> to vector<8x1xf32>
    %199 = vector.broadcast %198 : vector<8x1xf32> to vector<8x128xf32>
    %200 = arith.mulf %199, %197 : vector<8x128xf32>
    %201 = arith.addf %135, %200 : vector<8x128xf32>
    %c1 = arith.constant 1 : index
    %c0_80 = arith.constant 0 : index
    %c0_81 = arith.constant 0 : index
    %202 = vector.load %arg16[%c1, %c0_80, %c0_81] : memref<4x128x128xbf16, #tpu.memory_space<vmem>>, vector<1x128x128xbf16>
    %203 = vector.shape_cast %202 : vector<1x128x128xbf16> to vector<128x128xbf16>
    %cst_82 = arith.constant dense<0.000000e+00> : vector<8x128xf32>
    %204 = tpu.matmul %121, %203, %cst_82 {dimension_numbers = #tpu.dot_dimension_numbers<[1], [0], [0], [1], [0, 0, 1, 1], [], []>} : vector<8x128xbf16>, vector<128x128xbf16>, vector<8x128xf32> -> vector<8x128xf32>
    %205 = vector.extract_strided_slice %204 {offsets = [0, 0], sizes = [8, 64], strides = [1, 1]} : vector<8x128xf32> to vector<8x64xf32>
    %206 = arith.negf %205 : vector<8x64xf32>
    %207 = math.exp %206 : vector<8x64xf32>
    %cst_83 = arith.constant 1.000000e+00 : f32
    %208 = vector.broadcast %cst_83 : f32 to vector<8x64xf32>
    %209 = arith.addf %208, %207 : vector<8x64xf32>
    %210 = arith.divf %208, %209 : vector<8x64xf32>
    %211 = arith.mulf %205, %210 : vector<8x64xf32>
    %212 = vector.extract_strided_slice %204 {offsets = [0, 64], sizes = [8, 64], strides = [1, 1]} : vector<8x128xf32> to vector<8x64xf32>
    %213 = arith.mulf %211, %212 : vector<8x64xf32>
    %214 = arith.truncf %213 : vector<8x64xf32> to vector<8x64xbf16>
    %c1_84 = arith.constant 1 : index
    %c0_85 = arith.constant 0 : index
    %c0_86 = arith.constant 0 : index
    %215 = vector.load %arg17[%c1_84, %c0_85, %c0_86] : memref<4x64x128xbf16, #tpu.memory_space<vmem>>, vector<1x64x128xbf16>
    %216 = vector.shape_cast %215 : vector<1x64x128xbf16> to vector<64x128xbf16>
    %cst_87 = arith.constant dense<0.000000e+00> : vector<8x128xf32>
    %217 = tpu.matmul %214, %216, %cst_87 {dimension_numbers = #tpu.dot_dimension_numbers<[1], [0], [0], [1], [0, 0, 1, 1], [], []>} : vector<8x64xbf16>, vector<64x128xbf16>, vector<8x128xf32> -> vector<8x128xf32>
    %218 = vector.extract_strided_slice %181 {offsets = [0, 1], sizes = [8, 1], strides = [1, 1]} : vector<8x4xf32> to vector<8x1xf32>
    %219 = vector.broadcast %218 : vector<8x1xf32> to vector<8x128xf32>
    %220 = arith.mulf %219, %217 : vector<8x128xf32>
    %221 = arith.addf %201, %220 : vector<8x128xf32>
    %c2 = arith.constant 2 : index
    %c0_88 = arith.constant 0 : index
    %c0_89 = arith.constant 0 : index
    %222 = vector.load %arg16[%c2, %c0_88, %c0_89] : memref<4x128x128xbf16, #tpu.memory_space<vmem>>, vector<1x128x128xbf16>
    %223 = vector.shape_cast %222 : vector<1x128x128xbf16> to vector<128x128xbf16>
    %cst_90 = arith.constant dense<0.000000e+00> : vector<8x128xf32>
    %224 = tpu.matmul %121, %223, %cst_90 {dimension_numbers = #tpu.dot_dimension_numbers<[1], [0], [0], [1], [0, 0, 1, 1], [], []>} : vector<8x128xbf16>, vector<128x128xbf16>, vector<8x128xf32> -> vector<8x128xf32>
    %225 = vector.extract_strided_slice %224 {offsets = [0, 0], sizes = [8, 64], strides = [1, 1]} : vector<8x128xf32> to vector<8x64xf32>
    %226 = arith.negf %225 : vector<8x64xf32>
    %227 = math.exp %226 : vector<8x64xf32>
    %cst_91 = arith.constant 1.000000e+00 : f32
    %228 = vector.broadcast %cst_91 : f32 to vector<8x64xf32>
    %229 = arith.addf %228, %227 : vector<8x64xf32>
    %230 = arith.divf %228, %229 : vector<8x64xf32>
    %231 = arith.mulf %225, %230 : vector<8x64xf32>
    %232 = vector.extract_strided_slice %224 {offsets = [0, 64], sizes = [8, 64], strides = [1, 1]} : vector<8x128xf32> to vector<8x64xf32>
    %233 = arith.mulf %231, %232 : vector<8x64xf32>
    %234 = arith.truncf %233 : vector<8x64xf32> to vector<8x64xbf16>
    %c2_92 = arith.constant 2 : index
    %c0_93 = arith.constant 0 : index
    %c0_94 = arith.constant 0 : index
    %235 = vector.load %arg17[%c2_92, %c0_93, %c0_94] : memref<4x64x128xbf16, #tpu.memory_space<vmem>>, vector<1x64x128xbf16>
    %236 = vector.shape_cast %235 : vector<1x64x128xbf16> to vector<64x128xbf16>
    %cst_95 = arith.constant dense<0.000000e+00> : vector<8x128xf32>
    %237 = tpu.matmul %234, %236, %cst_95 {dimension_numbers = #tpu.dot_dimension_numbers<[1], [0], [0], [1], [0, 0, 1, 1], [], []>} : vector<8x64xbf16>, vector<64x128xbf16>, vector<8x128xf32> -> vector<8x128xf32>
    %238 = vector.extract_strided_slice %181 {offsets = [0, 2], sizes = [8, 1], strides = [1, 1]} : vector<8x4xf32> to vector<8x1xf32>
    %239 = vector.broadcast %238 : vector<8x1xf32> to vector<8x128xf32>
    %240 = arith.mulf %239, %237 : vector<8x128xf32>
    %241 = arith.addf %221, %240 : vector<8x128xf32>
    %c3 = arith.constant 3 : index
    %c0_96 = arith.constant 0 : index
    %c0_97 = arith.constant 0 : index
    %242 = vector.load %arg16[%c3, %c0_96, %c0_97] : memref<4x128x128xbf16, #tpu.memory_space<vmem>>, vector<1x128x128xbf16>
    %243 = vector.shape_cast %242 : vector<1x128x128xbf16> to vector<128x128xbf16>
    %cst_98 = arith.constant dense<0.000000e+00> : vector<8x128xf32>
    %244 = tpu.matmul %121, %243, %cst_98 {dimension_numbers = #tpu.dot_dimension_numbers<[1], [0], [0], [1], [0, 0, 1, 1], [], []>} : vector<8x128xbf16>, vector<128x128xbf16>, vector<8x128xf32> -> vector<8x128xf32>
    %245 = vector.extract_strided_slice %244 {offsets = [0, 0], sizes = [8, 64], strides = [1, 1]} : vector<8x128xf32> to vector<8x64xf32>
    %246 = arith.negf %245 : vector<8x64xf32>
    %247 = math.exp %246 : vector<8x64xf32>
    %cst_99 = arith.constant 1.000000e+00 : f32
    %248 = vector.broadcast %cst_99 : f32 to vector<8x64xf32>
    %249 = arith.addf %248, %247 : vector<8x64xf32>
    %250 = arith.divf %248, %249 : vector<8x64xf32>
    %251 = arith.mulf %245, %250 : vector<8x64xf32>
    %252 = vector.extract_strided_slice %244 {offsets = [0, 64], sizes = [8, 64], strides = [1, 1]} : vector<8x128xf32> to vector<8x64xf32>
    %253 = arith.mulf %251, %252 : vector<8x64xf32>
    %254 = arith.truncf %253 : vector<8x64xf32> to vector<8x64xbf16>
    %c3_100 = arith.constant 3 : index
    %c0_101 = arith.constant 0 : index
    %c0_102 = arith.constant 0 : index
    %255 = vector.load %arg17[%c3_100, %c0_101, %c0_102] : memref<4x64x128xbf16, #tpu.memory_space<vmem>>, vector<1x64x128xbf16>
    %256 = vector.shape_cast %255 : vector<1x64x128xbf16> to vector<64x128xbf16>
    %cst_103 = arith.constant dense<0.000000e+00> : vector<8x128xf32>
    %257 = tpu.matmul %254, %256, %cst_103 {dimension_numbers = #tpu.dot_dimension_numbers<[1], [0], [0], [1], [0, 0, 1, 1], [], []>} : vector<8x64xbf16>, vector<64x128xbf16>, vector<8x128xf32> -> vector<8x128xf32>
    %258 = vector.extract_strided_slice %181 {offsets = [0, 3], sizes = [8, 1], strides = [1, 1]} : vector<8x4xf32> to vector<8x1xf32>
    %259 = vector.broadcast %258 : vector<8x1xf32> to vector<8x128xf32>
    %260 = arith.mulf %259, %257 : vector<8x128xf32>
    %261 = arith.addf %241, %260 : vector<8x128xf32>
    %c0_104 = arith.constant 0 : index
    %c0_105 = arith.constant 0 : index
    %262 = vector.load %arg18[%c0_104, %c0_105] : memref<8x128xf32, #tpu.memory_space<vmem>>, vector<8x128xf32>
    tpu.vector_store %arg18[%c0_104, %c0_105], %261 {strides = array<i32>} : memref<8x128xf32, #tpu.memory_space<vmem>>, vector<8x128xf32>,
    return
  }
}

</mosaic_0001>

<bundles_post_ra>
// kernel: tile.14
= control target key start
LH: loop header
LB: loop body
LE: loop exit
PB: predicated region body
PF: predicated region fallthrough
CT: control target
= control target key end

     0   :  { %vm42_vm0 = vcmask 1047556   ;;  %vm44_vm1 = vcmask 261120   ;;  %s93_s22 = smov 32   ;;  %s94_s25 = smov 64   ;;  %vm54_vm2 = vcmask 1048320   ;;  %vm64_vm3 = vcmask 785920   ;;  %s146_s0 = inlined_call_operand.vmem [shape: f32[8,4,32], index: 0, kind: input, shape index: {}]   ;;  %s147_s1 = inlined_call_operand.vmem [shape: f32[8,128], index: 1, kind: output, shape index: {}]  }
   0x1   :  { %v82_v0 = vld [vmem:[%s146_s0 + $0x1c] sm:$0xf]  ;;  %v83_v1 = vld [vmem:[%s146_s0 + $0x18] sm:$0xf]  ;;  %v84_v2 = vld [vmem:[%s146_s0 + $0x14] sm:$0xf] }
   0x2   :  { %8 = vst [vmem:[#allocation0 + $0x38] sm:$0xf] %v82_v0  ;;  %13 = vst [vmem:[#allocation0 + $0x30] sm:$0xf] %v83_v1  ;;  %v85_v3 = vld [vmem:[%s146_s0 + $0x10] sm:$0xf] }
   0x3   :  { %18 = vst [vmem:[#allocation0 + $0x28] sm:$0xf] %v84_v2  ;;  %v86_v4 = vld [vmem:[%s146_s0 + $0xc] sm:$0xf]  ;;  %v87_v5 = vld [vmem:[%s146_s0 + $0x8] sm:$0xf] }
   0x4   :  { %23 = vst [vmem:[#allocation0 + $0x20] sm:$0xf] %v85_v3  ;;  %28 = vst [vmem:[#allocation0 + $0x18] sm:$0xf] %v86_v4  ;;  %v88_v6 = vld [vmem:[%s146_s0 + $0x4] sm:$0xf] }
   0x5   :  { %33 = vst [vmem:[#allocation0 + $0x10] sm:$0xf] %v87_v5  ;;  %v38_v7 = vld [vmem:[%s146_s0] sm:$0xf]  ;;  %37 = vst [vmem:[#allocation0 + $0x8] sm:$0xf] %v88_v6 }
   0x6   :  { %39 = vst [vmem:[#allocation0] sm:$0xf] %v38_v7  ;;  %s92_s0 = smov 96   ;;  %vm74_vm4 = vcmask 523520  }
   0xb   :  { %v49_v8 = vld [vmem:[#allocation0 + $0x3] ss:$8 sm:$0xf0]   ;;  %v59_v9 = vld [vmem:[#allocation0 + $0x2] ss:$8 sm:$0xf0]  }
   0xc   :  { %v69_v14 = vld [vmem:[#allocation0 + $0x1] ss:$8 sm:$0xf0]   ;;  %v41_v17 = vld [vmem:[#allocation0] ss:$8 sm:$0xf0]  }
   0xd   :  { %v47_v10 = vld [vmem:[#allocation0 + $0x3] ss:$8 sm:$0xf]   ;;  %v57_v11 = vld [vmem:[#allocation0 + $0x2] ss:$8 sm:$0xf]  }
   0xe   :  { %v51_v12 = vsel %vm42_vm0, %v49_v8, %v47_v10  ;;  %v67_v13 = vld [vmem:[#allocation0 + $0x1] ss:$8 sm:$0xf]   ;;  %v40_v16 = vld [vmem:[#allocation0] ss:$8 sm:$0xf]   ;;  %v61_v18 = vsel %vm42_vm0, %v59_v9, %v57_v11 }
   0xf   :  { %52 = vrot.lane.b32.xlu0 %v51_v12, %s92_s0  ;;  %v71_v15 = vsel %vm42_vm0, %v69_v14, %v67_v13  ;;  %v43_v19 = vsel %vm42_vm0, %v41_v17, %v40_v16 }
  0x10   :  { %72 = vrot.lane.b32.xlu1 %v71_v15, %s93_s22  ;;  %45 = vst.msk [vmem:[%s147_s1] sm:$0xff] %vm44_vm1, %v43_v19  }
  0x13   :  { %62 = vrot.lane.b32.xlu0 %v61_v18, %s94_s25 }
  0x81   :  { %v53_v20 = vpop.permute.xlu0 %52  }
  0x82   :  { %55 = vst.msk [vmem:[%s147_s1] sm:$0xff] %vm54_vm2, %v53_v20   ;;  %v73_v21 = vpop.permute.xlu1 %72  }
  0x85   :  { %v63_v22 = vpop.permute.xlu0 %62  }
  0x86   :  { %65 = vst.msk [vmem:[%s147_s1] sm:$0xff] %vm64_vm3, %v63_v22  }
  0x87   :  { %75 = vst.msk [vmem:[%s147_s1] sm:$0xff] %vm74_vm4, %v73_v21  }

// kernel: decoder_layer_forward.1
= control target key start
LH: loop header
LB: loop body
LE: loop exit
PB: predicated region body
PF: predicated region fallthrough
CT: control target
= control target key end

     0   :  { %s4360_s0 = inlined_call_operand.vmem [shape: f32[8,128], index: 0, kind: input, shape index: {}]   ;;  %s4361_s1 = inlined_call_operand.vmem [shape: f32[8,128], index: 1, kind: input, shape index: {}]   ;;  %s4362_s2 = inlined_call_operand.hbm [shape: f32[1,128], index: 2, kind: input, shape index: {}]   ;;  %s4363_s3 = inlined_call_operand.hbm [shape: f32[1,128], index: 3, kind: input, shape index: {}]   ;;  %s4364_s4 = inlined_call_operand.vmem [shape: bf16[128,128], index: 4, kind: input, shape index: {}]   ;;  %s4365_s5 = inlined_call_operand.vmem [shape: bf16[128,128], index: 5, kind: input, shape index: {}]   ;;  %s4366_s6 = inlined_call_operand.vmem [shape: bf16[128,64], index: 6, kind: input, shape index: {}]   ;;  %s4367_s7 = inlined_call_operand.vmem [shape: bf16[128,64], index: 7, kind: input, shape index: {}]   ;;  %s4368_s8 = inlined_call_operand.vmem [shape: bf16[128,64], index: 8, kind: input, shape index: {}]   ;;  %s4369_s9 = inlined_call_operand.vmem [shape: bf16[128,128], index: 9, kind: input, shape index: {}]   ;;  %s4370_s10 = inlined_call_operand.vmem [shape: f32[8,128], index: 10, kind: input, shape index: {}]   ;;  %s4371_s11 = inlined_call_operand.vmem [shape: f32[8,128], index: 11, kind: input, shape index: {}]   ;;  %s4372_s12 = inlined_call_operand.vmem [shape: f32[128,4], index: 12, kind: input, shape index: {}]   ;;  %s4373_s13 = inlined_call_operand.hbm [shape: f32[1,4], index: 13, kind: input, shape index: {}]   ;;  %s4374_s14 = inlined_call_operand.vmem [shape: bf16[128,128], index: 14, kind: input, shape index: {}]   ;;  %s4375_s15 = inlined_call_operand.hbm [shape: bf16[64,128], index: 15, kind: input, shape index: {}]   ;;  %s4376_s16 = inlined_call_operand.vmem [shape: bf16[4,128,128], index: 16, kind: input, shape index: {}]   ;;  %s4377_s17 = inlined_call_operand.vmem [shape: bf16[4,64,128], index: 17, kind: input, shape index: {}]   ;;  %s4378_s18 = inlined_call_operand.hbm [shape: f32[8,128], index: 18, kind: output, shape index: {0}]   ;;  %s4379_s19 = inlined_call_operand.hbm [shape: f32[8,128], index: 19, kind: output, shape index: {1}]  }
   0x1   :  { %4382 = sst [smem:[#allocation19_spill]] %s4360_s0 }
   0x2   :  { %4383 = sst [smem:[#allocation20_spill]] %s4361_s1 }
   0x3   :  { %4384 = sst [smem:[#allocation21_spill]] %s4362_s2 }
   0x4   :  { %4385 = sst [smem:[#allocation22_spill]] %s4363_s3 }
   0x5   :  { %25 = vsyncpa [#allocation4], 0 }
   0x6   :  { %26 = vsyncpa [#allocation7], 0 }
   0x7   :  { %27 = vsyncpa [#allocation10], 0 }
   0x8   :  { %28 = vsyncpa [#allocation5], 0 }
   0x9   :  { %29 = vsyncpa [#allocation13], 0  ;;  %s3498_s0 = smov [#allocation6]   ;;  %s3499_s20 = smov [#allocation3]  }
   0xa   :  { %s50_s30 = sshll.u32 %s3498_s0, 4  ;;  %s40_s21 = sshll.u32 %s3499_s20, 4  ;;  %s51_s30 = int_to_ptr.vmem [resolvable:$true] %s50_s30  ;;  %s41_s21 = int_to_ptr.vmem [resolvable:$true] %s40_s21 }
   0xb   :  { %s4386_s2 = sld [smem:[#allocation22_spill]] }
  0x11   :  { %s3356_s23 = scalar_lea.hbm %s4386_s2, 16 }
  0x12   :  { %p3357_p0 = scmp.ne.s32.totalorder %s4386_s2, %s3356_s23  ;;  %p3360_p1 = scmp.lt.u32.totalorder %s3356_s23, %s4386_s2 }
  0x14   :  { %p3362_p2 = pnand %p3360_p1, %p3357_p0 }
  0x16   :  { %3365 = shalt.err (!%p3362_p2)
}
  0x17   :  { %s3366_s27 = scalar_lea.vmem %s51_s30, 16  ;;  %s3370_s28 = scalar_lea.vmem %s51_s30, 32 }
  0x18   :  { %p3367_p3 = scmp.ne.s32.totalorder %s51_s30, %s3366_s27  ;;  %p3371_p4 = scmp.lt.s32.totalorder %s51_s30, %s51_s30 }
  0x19   :  { %p3372_p5 = scmp.lt.s32.totalorder %s3370_s28, %s3366_s27 }
  0x1b   :  { %p3373_p6 = por %p3372_p5, %p3371_p4 }
  0x1d   :  { %p3374_p7 = pnand %p3373_p6, %p3367_p3 }
  0x1f   :  { %3377 = shalt.err (!%p3374_p7)
}
  0x20   :  { %53 = dma.hbm_to_vmem [thread:$0]  %s4386_s2, 16, %s51_s30, [#allocation7]  }
  0x21   :  { %s4387_s22 = sld [smem:[#allocation21_spill]] }
  0x27   :  { %s3378_s24 = scalar_lea.hbm %s4387_s22, 16 }
  0x28   :  { %p3379_p8 = scmp.ne.s32.totalorder %s4387_s22, %s3378_s24  ;;  %p3382_p9 = scmp.lt.u32.totalorder %s3378_s24, %s4387_s22 }
  0x2a   :  { %p3384_p10 = pnand %p3382_p9, %p3379_p8 }
  0x2c   :  { %3387 = shalt.err (!%p3384_p10)
}
  0x2d   :  { %s3388_s27 = scalar_lea.vmem %s41_s21, 16  ;;  %s3392_s28 = scalar_lea.vmem %s41_s21, 32 }
  0x2e   :  { %p3389_p11 = scmp.ne.s32.totalorder %s41_s21, %s3388_s27  ;;  %p3393_p12 = scmp.lt.s32.totalorder %s41_s21, %s41_s21 }
  0x2f   :  { %p3394_p13 = scmp.lt.s32.totalorder %s3392_s28, %s3388_s27 }
  0x31   :  { %p3395_p0 = por %p3394_p13, %p3393_p12 }
  0x33   :  { %p3396_p1 = pnand %p3395_p0, %p3389_p11 }
  0x35   :  { %3399 = shalt.err (!%p3396_p1)
}
  0x36   :  { %43 = dma.hbm_to_vmem [thread:$0]  %s4387_s22, 16, %s41_s21, [#allocation4]  }
  0x37   :  { %s3500_s29 = smov [#allocation8]   ;;  %s3501_s20 = smov [#allocation9]  }
  0x38   :  { %s78_s0 = sshll.u32 %s3500_s29, 4  ;;  %s89_s1 = sshll.u32 %s3501_s20, 4  ;;  %s79_s0 = int_to_ptr.vmem [resolvable:$true] %s78_s0  ;;  %s3639_s1 = int_to_ptr.vmem [resolvable:$true] %s89_s1 }
  0x39   :  { %s3400_s23 = scalar_lea.hbm %s4373_s13, 16 }
  0x3a   :  { %p3401_p2 = scmp.ne.s32.totalorder %s4373_s13, %s3400_s23  ;;  %p3404_p3 = scmp.lt.u32.totalorder %s3400_s23, %s4373_s13 }
  0x3c   :  { %p3406_p4 = pnand %p3404_p3, %p3401_p2 }
  0x3e   :  { %3409 = shalt.err (!%p3406_p4)
}
  0x3f   :  { %s3410_s21 = scalar_lea.vmem %s79_s0, 16  ;;  %s3414_s22 = scalar_lea.vmem %s79_s0, 32 }
  0x40   :  { %p3411_p5 = scmp.ne.s32.totalorder %s79_s0, %s3410_s21  ;;  %p3415_p6 = scmp.lt.s32.totalorder %s79_s0, %s79_s0 }
  0x41   :  { %p3416_p7 = scmp.lt.s32.totalorder %s3414_s22, %s3410_s21 }
  0x43   :  { %p3417_p8 = por %p3416_p7, %p3415_p6 }
  0x45   :  { %p3418_p9 = pnand %p3417_p8, %p3411_p5 }
  0x47   :  { %3421 = shalt.err (!%p3418_p9)
}
  0x48   :  { %81 = dma.hbm_to_vmem [thread:$0]  %s4373_s13, 16, %s79_s0, [#allocation7]  }
  0x49   :  { %s3422_s24 = scalar_lea.hbm %s4375_s15, 512 }
  0x4a   :  { %p3423_p10 = scmp.ne.s32.totalorder %s4375_s15, %s3422_s24  ;;  %p3426_p11 = scmp.lt.u32.totalorder %s3422_s24, %s4375_s15 }
  0x4c   :  { %p3428_p12 = pnand %p3426_p11, %p3423_p10 }
  0x4e   :  { %3431 = shalt.err (!%p3428_p12)
}
  0x4f   :  { %s3432_s27 = scalar_lea.vmem %s3639_s1, 512  ;;  %p3437_p0 = scmp.lt.s32.totalorder %s3639_s1, %s3639_s1 }
  0x50   :  { %p3433_p13 = scmp.ne.s32.totalorder %s3639_s1, %s3432_s27  ;;  %p3438_p1 = scmp.lt.s32.totalorder %s3432_s27, %s3432_s27 }
  0x52   :  { %p3439_p2 = por %p3438_p1, %p3437_p0 }
  0x54   :  { %p3440_p3 = pnand %p3439_p2, %p3433_p13 }
  0x56   :  { %3443 = shalt.err (!%p3440_p3)
}
  0x57   :  { %s3502_s13 = smov 64   ;;  %s3503_s0 = smov 4  }
  0x58   :  { %95 = dma.hbm_to_vmem [thread:$0]  %s4375_s15, 512, %s3639_s1, [#allocation10], %s3502_s13, %s3502_s13, %s3503_s0  }
  0x59   :  { %3488 = dma.done.wait [#allocation4], 16  }
  0x5a   :  { %3489 = vsyncadd [#allocation4], 4294967280 }
  0x5b   :  { %3490 = dma.done.wait [#allocation7], 32  }
  0x5c   :  { %3491 = vsyncadd [#allocation7], 4294967264 }
  0x5d   :  { %3492 = dma.done.wait [#allocation10], 512  }
  0x5e   :  { %3493 = vsyncadd [#allocation10], 4294966784  ;;  %v3504_v0 = vmov 0.0   ;;  %s4388_s2 = sld [smem:[#allocation19_spill]]  ;;  %s4389_s24 = sld [smem:[#allocation20_spill]]  ;;  %v3202_v4 = vld [vmem:[%s4364_s4] sm:$0xff]  }
  0x5f   :  { %2788 = vmatprep.subr.bf16.mxu0 %v3504_v0  ;;  %2808 = vmatprep.subr.bf16.mxu1 %v3504_v0  ;;  %v3203_v5 = vld [vmem:[%s4365_s5] sm:$0xff]   ;;  %v3204_v7 = vld [vmem:[%s4364_s4 + $0x8] sm:$0xff]   ;;  %v3206_v9 = vld [vmem:[%s4364_s4 + $0x10] sm:$0xff]   ;;  %vm3505_vm0 = vmmov 0   ;;  %vm692_vm1 = vcmask 261120   ;;  %vm933_vm2 = vcmask 1043456  }
  0x60   :  { %2789 = vmatpush3.bf16.msra.mxu0 %v3202_v4  ;;  %2809 = vmatpush3.bf16.msra.mxu1 %v3203_v5  ;;  %v3205_v8 = vld [vmem:[%s4365_s5 + $0x8] sm:$0xff]   ;;  %v3207_v10 = vld [vmem:[%s4365_s5 + $0x10] sm:$0xff]   ;;  %v3208_v11 = vld [vmem:[%s4364_s4 + $0x18] sm:$0xff]   ;;  %vm881_vm4 = vcmask 64512   ;;  %vm1114_vm5 = vcmask 523520   ;;  %vm1120_vm6 = vcmask 785920  }
  0x61   :  { %2790 = vmatprep.subr.bf16.mxu0 %v3504_v0  ;;  %2810 = vmatprep.subr.bf16.mxu1 %v3504_v0  ;;  %v3209_v12 = vld [vmem:[%s4365_s5 + $0x18] sm:$0xff]   ;;  %v3210_v13 = vld [vmem:[%s4364_s4 + $0x20] sm:$0xff]   ;;  %v3212_v15 = vld [vmem:[%s4364_s4 + $0x28] sm:$0xff]   ;;  %vm1126_vm7 = vcmask 1048320   ;;  %vm1681_vm8 = vcmask 523264   ;;  %vm1462_vm9 = vcmask 31744  }
  0x62   :  { %v3211_v14 = vld [vmem:[%s4365_s5 + $0x20] sm:$0xff]   ;;  %v3213_v16 = vld [vmem:[%s4365_s5 + $0x28] sm:$0xff]   ;;  %v3214_v17 = vld [vmem:[%s4364_s4 + $0x30] sm:$0xff]   ;;  %2804 = vmatprep.mubr.msk.bf16.mxu0 %vm3505_vm0, %v3504_v0  ;;  %2824 = vmatprep.mubr.msk.bf16.mxu1 %vm3505_vm0, %v3504_v0 }
  0x63   :  { %v3215_v18 = vld [vmem:[%s4365_s5 + $0x30] sm:$0xff]   ;;  %v3216_v19 = vld [vmem:[%s4364_s4 + $0x38] sm:$0xff]   ;;  %v2430_v25 = vld [vmem:[#allocation3] ss:$0 sm:$0xff] }
  0x64   :  { %v113_v1 = vld [vmem:[%s4388_s2] sm:$0xff]  ;;  %2791 = vmatpush3.bf16.msra.mxu0 %v3204_v7  ;;  %2811 = vmatpush3.bf16.msra.mxu1 %v3205_v8  ;;  %v3217_v20 = vld [vmem:[%s4365_s5 + $0x38] sm:$0xff]   ;;  %v3220_v31 = vld [vmem:[%s4366_s6 + $0x8] sm:$0xff]  }
  0x65   :  { %v114_v2 = vld [vmem:[%s4389_s24] sm:$0xff]  ;;  %2792 = vmatprep.subr.bf16.mxu0 %v3504_v0  ;;  %2812 = vmatprep.subr.bf16.mxu1 %v3504_v0  ;;  %v3221_v32 = vld [vmem:[%s4367_s7 + $0x8] sm:$0xff]   ;;  %v3222_v33 = vld [vmem:[%s4366_s6 + $0x10] sm:$0xff]  }
  0x66   :  { %v3680_v3 = vadd.f32 %v114_v2, %v113_v1  ;;  %v3218_v28 = vld [vmem:[%s4366_s6] sm:$0xff]   ;;  %v3223_v34 = vld [vmem:[%s4367_s7 + $0x10] sm:$0xff]   ;;  %v3224_v35 = vld [vmem:[%s4366_s6 + $0x18] sm:$0xff]  }
  0x67   :  { %v3219_v29 = vld [vmem:[%s4367_s7] sm:$0xff]   ;;  %v3225_v36 = vld [vmem:[%s4367_s7 + $0x18] sm:$0xff]   ;;  %v3228_v39 = vld [vmem:[%s4366_s6 + $0x28] sm:$0xff]  }
  0x68   :  { %v116_v6 = vmul.f32 %v3680_v3, %v3680_v3  ;;  %2793 = vmatpush3.bf16.msra.mxu0 %v3206_v9  ;;  %2813 = vmatpush3.bf16.msra.mxu1 %v3207_v10  ;;  %v3226_v37 = vld [vmem:[%s4366_s6 + $0x20] sm:$0xff]   ;;  %v3229_v40 = vld [vmem:[%s4367_s7 + $0x28] sm:$0xff]   ;;  %v3230_v41 = vld [vmem:[%s4366_s6 + $0x30] sm:$0xff]  }
  0x69   :  { %2794 = vmatprep.subr.bf16.mxu0 %v3504_v0  ;;  %2814 = vmatprep.subr.bf16.mxu1 %v3504_v0  ;;  %v3227_v38 = vld [vmem:[%s4367_s7 + $0x20] sm:$0xff]   ;;  %v3231_v42 = vld [vmem:[%s4367_s7 + $0x30] sm:$0xff]   ;;  %v3232_v43 = vld [vmem:[%s4366_s6 + $0x38] sm:$0xff]  }
  0x6a   :  { %117 = vadd.xlane.f32.xlu0 %v116_v6  ;;  %v3233_v44 = vld [vmem:[%s4367_s7 + $0x38] sm:$0xff]   ;;  %v3234_v45 = vld [vmem:[%s4368_s8] sm:$0xff]   ;;  %v3235_v46 = vld [vmem:[%s4368_s8 + $0x8] sm:$0xff]  }
  0x6b   :  { %v3236_v47 = vld [vmem:[%s4368_s8 + $0x10] sm:$0xff]   ;;  %v3237_v48 = vld [vmem:[%s4368_s8 + $0x18] sm:$0xff]   ;;  %v3238_v49 = vld [vmem:[%s4368_s8 + $0x20] sm:$0xff]  }
  0x6c   :  { %2795 = vmatpush3.bf16.msra.mxu0 %v3208_v11  ;;  %2815 = vmatpush3.bf16.msra.mxu1 %v3209_v12  ;;  %v3239_v50 = vld [vmem:[%s4368_s8 + $0x28] sm:$0xff]   ;;  %v3240_v51 = vld [vmem:[%s4368_s8 + $0x30] sm:$0xff]   ;;  %v3241_v52 = vld [vmem:[%s4368_s8 + $0x38] sm:$0xff]   ;;  %s3506_s8 = smov 32  }
  0x6d   :  { %2796 = vmatprep.subr.bf16.mxu0 %v3504_v0  ;;  %2816 = vmatprep.subr.bf16.mxu1 %v3504_v0  ;;  %v133_v53 = vld [vmem:[%s4370_s10] sm:$0xff]  ;;  %s3507_s10 = smov 96  }
  0x6e   :  { %v134_v54 = vld [vmem:[%s4371_s11] sm:$0xff] }
  0x70   :  { %2797 = vmatpush3.bf16.msra.mxu0 %v3210_v13  ;;  %2817 = vmatpush3.bf16.msra.mxu1 %v3211_v14 }
  0x71   :  { %2798 = vmatprep.subr.bf16.mxu0 %v3504_v0  ;;  %2818 = vmatprep.subr.bf16.mxu1 %v3504_v0 }
  0x74   :  { %2799 = vmatpush3.bf16.msra.mxu0 %v3212_v15  ;;  %2819 = vmatpush3.bf16.msra.mxu1 %v3213_v16 }
  0x75   :  { %2800 = vmatprep.subr.bf16.mxu0 %v3504_v0  ;;  %2820 = vmatprep.subr.bf16.mxu1 %v3504_v0 }
  0x78   :  { %2801 = vmatpush3.bf16.msra.mxu0 %v3214_v17  ;;  %2821 = vmatpush3.bf16.msra.mxu1 %v3215_v18 }
  0x79   :  { %2802 = vmatprep.subr.bf16.mxu0 %v3504_v0  ;;  %2822 = vmatprep.subr.bf16.mxu1 %v3504_v0 }
  0x7c   :  { %2803 = vmatpush3.bf16.msra.mxu0 %v3216_v19  ;;  %2823 = vmatpush3.bf16.msra.mxu1 %v3217_v20 }
  0x7d   :  { %2828 = vmatprep.subr.bf16.mxu0 %v3504_v0  ;;  %2848 = vmatprep.subr.bf16.mxu1 %v3504_v0 }
  0xf7   :  { %v118_v21 = vpop.xlane.xlu0 %117 }
  0xf8   :  { %v120_v22 = vmul.f32 0.0078125, %v118_v21 }
  0xfa   :  { %v121_v23 = vadd.f32 1e-05, %v120_v22 }
  0xfc   :  { %3310 = vrsqrt.f32 %v121_v23 }
 0x106   :  { %v3311_v24 = vpop.eup %3310 }
 0x107   :  { %v123_v26 = vmul.f32 %v3311_v24, %v3680_v3 }
 0x109   :  { %v131_v27 = vmul.f32 %v2430_v25, %v123_v26 }
 0x10b   :  { %v3759_v30 = vpack.c.bf16 %v131_v27, %v131_v27 }
 0x10d   :  { %2805 = vmatmul.mubr.bf16.vlgmr.msra.gmra.mrb[0].mxu0 %v3759_v30  ;;  %2825 = vmatmul.mubr.bf16.vlgmr.msra.gmra.mrb[0].mxu1 %v3759_v30 }
 0x10e   :  { %2829 = vmatpush3.bf16.msra.mxu0 %v3218_v28  ;;  %2849 = vmatpush3.bf16.msra.mxu1 %v3219_v29 }
 0x10f   :  { %2830 = vmatprep.subr.bf16.mxu0 %v3504_v0  ;;  %2850 = vmatprep.subr.bf16.mxu1 %v3504_v0 }
 0x110   :  { %2844 = vmatprep.mubr.msk.bf16.mxu0 %vm3505_vm0, %v3504_v0  ;;  %2864 = vmatprep.mubr.msk.bf16.mxu1 %vm3505_vm0, %v3504_v0 }
 0x112   :  { %2831 = vmatpush3.bf16.msra.mxu0 %v3220_v31  ;;  %2851 = vmatpush3.bf16.msra.mxu1 %v3221_v32 }
 0x113   :  { %2832 = vmatprep.subr.bf16.mxu0 %v3504_v0  ;;  %2852 = vmatprep.subr.bf16.mxu1 %v3504_v0 }
 0x116   :  { %2833 = vmatpush3.bf16.msra.mxu0 %v3222_v33  ;;  %2853 = vmatpush3.bf16.msra.mxu1 %v3223_v34 }
 0x117   :  { %2834 = vmatprep.subr.bf16.mxu0 %v3504_v0  ;;  %2854 = vmatprep.subr.bf16.mxu1 %v3504_v0 }
 0x11a   :  { %2835 = vmatpush3.bf16.msra.mxu0 %v3224_v35  ;;  %2855 = vmatpush3.bf16.msra.mxu1 %v3225_v36  ;;  %v661_v35 = vlaneseq }
 0x11b   :  { %2836 = vmatprep.subr.bf16.mxu0 %v3504_v0  ;;  %2856 = vmatprep.subr.bf16.mxu1 %v3504_v0 }
 0x11c   :  { %v662_v36 = vshrl.u32 %v661_v35, 7 }
 0x11e   :  { %2837 = vmatpush3.bf16.msra.mxu0 %v3226_v37  ;;  %2857 = vmatpush3.bf16.msra.mxu1 %v3227_v38  ;;  %v3902_v37 = vand.u32 127, %v661_v35 }
 0x11f   :  { %2838 = vmatprep.subr.bf16.mxu0 %v3504_v0  ;;  %2858 = vmatprep.subr.bf16.mxu1 %v3504_v0 }
 0x120   :  { %vm665_vm3 = vcmp.le.s32.totalorder %v3902_v37, %v662_v36 }
 0x122   :  { %2839 = vmatpush3.bf16.msra.mxu0 %v3228_v39  ;;  %2859 = vmatpush3.bf16.msra.mxu1 %v3229_v40 }
 0x123   :  { %2840 = vmatprep.subr.bf16.mxu0 %v3504_v0  ;;  %2860 = vmatprep.subr.bf16.mxu1 %v3504_v0 }
 0x126   :  { %2841 = vmatpush3.bf16.msra.mxu0 %v3230_v41  ;;  %2861 = vmatpush3.bf16.msra.mxu1 %v3231_v42 }
 0x127   :  { %2842 = vmatprep.subr.bf16.mxu0 %v3504_v0  ;;  %2862 = vmatprep.subr.bf16.mxu1 %v3504_v0 }
 0x12a   :  { %2843 = vmatpush3.bf16.msra.mxu0 %v3232_v43  ;;  %2863 = vmatpush3.bf16.msra.mxu1 %v3233_v44 }
 0x12b   :  { %2868 = vmatprep.subr.bf16.mxu0 %v3504_v0  ;;  %2888 = vmatprep.subr.bf16.mxu1 %v3504_v0 }
 0x12d   :  { %2845 = vmatmul.mubr.bf16.vlgmr.msra.gmra.mrb[4].mxu0 %v3759_v30  ;;  %2865 = vmatmul.mubr.bf16.vlgmr.msra.gmra.mrb[4].mxu1 %v3759_v30 }
 0x12e   :  { %2869 = vmatpush3.bf16.msra.mxu0 %v3234_v45  ;;  %2884 = vmatprep.mubr.msk.bf16.mxu0 %vm3505_vm0, %v3504_v0 }
 0x12f   :  { %2870 = vmatprep.subr.bf16.mxu0 %v3504_v0  ;;  %2890 = vmatprep.mubr.msk.bf16.mxu1 %vm3505_vm0, %v3504_v0 }
 0x132   :  { %2871 = vmatpush3.bf16.msra.mxu0 %v3235_v46 }
 0x133   :  { %2872 = vmatprep.subr.bf16.mxu0 %v3504_v0 }
 0x136   :  { %2873 = vmatpush3.bf16.msra.mxu0 %v3236_v47 }
 0x137   :  { %2874 = vmatprep.subr.bf16.mxu0 %v3504_v0 }
 0x13a   :  { %2875 = vmatpush3.bf16.msra.mxu0 %v3237_v48 }
 0x13b   :  { %2876 = vmatprep.subr.bf16.mxu0 %v3504_v0 }
 0x13e   :  { %2877 = vmatpush3.bf16.msra.mxu0 %v3238_v49 }
 0x13f   :  { %2878 = vmatprep.subr.bf16.mxu0 %v3504_v0 }
 0x142   :  { %2879 = vmatpush3.bf16.msra.mxu0 %v3239_v50 }
 0x143   :  { %2880 = vmatprep.subr.bf16.mxu0 %v3504_v0 }
 0x146   :  { %2881 = vmatpush3.bf16.msra.mxu0 %v3240_v51 }
 0x147   :  { %2882 = vmatprep.subr.bf16.mxu0 %v3504_v0 }
 0x14a   :  { %2883 = vmatpush3.bf16.msra.mxu0 %v3241_v52 }
 0x14b   :  { %2924 = vmatprep.subr.bf16.mxu0 %v3504_v0 }
 0x14d   :  { %2885 = vmatmul.mubr.bf16.vlgmr.msra.gmra.mrb[8].mxu0 %v3759_v30 }
 0x14e   :  { %2926 = vmatprep.mubr.msk.bf16.mxu0 %vm3505_vm0, %v3504_v0 }
 0x1e0   :  { %v233_v55 = vpop.f32.mrb[0].mxu0  ;;  %v338_v56 = vpop.f32.mrb[0].mxu1 }
 0x1e1   :  { %v239_v57 = vmul.f32 %v233_v55, %v133_v53  ;;  %v344_v58 = vmul.f32 %v338_v56, %v134_v54  ;;  %v2806_v59 = vpop.f32.mrb[1].mxu0  ;;  %v2826_v60 = vpop.f32.mrb[1].mxu1 }
 0x1e2   :  { %v236_v61 = vpop.f32.mrb[2].mxu0  ;;  %v341_v62 = vpop.f32.mrb[2].mxu1 }
 0x1e3   :  { %v345_v63 = vadd.f32 %v344_v58, %v239_v57  ;;  %v2807_v1 = vpop.f32.mrb[3].mxu0  ;;  %v2827_v2 = vpop.f32.mrb[3].mxu1 }
 0x1e5   :  { %670 = vrot.lane.b32.xlu1 %v345_v63, %s3502_s13  ;;  %v676_v18 = vpack.c.bf16 %v345_v63, %v345_v63 }
 0x1e9   :  { %673 = vrot.lane.b32.xlu1 %v345_v63, %s3506_s8 }
 0x200   :  { %v444_v4 = vpop.f32.mrb[4].mxu0  ;;  %v549_v5 = vpop.f32.mrb[4].mxu1 }
 0x201   :  { %v450_v6 = vmul.f32 %v444_v4, %v133_v53  ;;  %v555_v7 = vmul.f32 %v549_v5, %v134_v54  ;;  %v2846_v8 = vpop.f32.mrb[5].mxu0  ;;  %v2866_v9 = vpop.f32.mrb[5].mxu1 }
 0x202   :  { %v447_v10 = vpop.f32.mrb[6].mxu0  ;;  %v552_v11 = vpop.f32.mrb[6].mxu1 }
 0x203   :  { %v556_v12 = vadd.f32 %v555_v7, %v450_v6  ;;  %v2847_v13 = vpop.f32.mrb[7].mxu0  ;;  %v2867_v14 = vpop.f32.mrb[7].mxu1 }
 0x205   :  { %v684_v15 = vpack.c.bf16 %v556_v12, %v556_v12  ;;  %v3192_v16 = vpack.i.bf16 %v556_v12, %v345_v63 }
 0x207   :  { %3193 = vrot.lane.b32.xlu0 %v3192_v16, %s3507_s10  ;;  %v697_v17 = vsel %vm692_vm1, %v684_v15, 0 }
 0x208   :  { %2889 = vmatpush3.bf16.xpose.msra.mxu1 %v697_v17 }
 0x209   :  { %2894 = vmatprep.subr.bf16.mxu1 %v3504_v0 }
 0x20f   :  { %2891 = vmatmul.mubr.msk.bf16.vlgmr.msra.gmra.mrb[8].mxu1 %vm692_vm1, %v676_v18 }
 0x210   :  { %2895 = vmatpush3.bf16.xpose.msra.mxu1 %v697_v17  ;;  %2896 = vmatprep.mubr.msk.bf16.mxu1 %vm3505_vm0, %v3504_v0 }
 0x211   :  { %2900 = vmatprep.subr.bf16.mxu1 %v3504_v0 }
 0x220   :  { %v3881_v19 = vpop.f32.mrb[8].mxu0 }
 0x221   :  { %v2886_v20 = vpop.f32.mrb[9].mxu0  ;;  %v690_v32 = vpack.c.bf16 %v3881_v19, %v3881_v19 }
 0x222   :  { %v658_v21 = vpop.f32.mrb[10].mxu0 }
 0x223   :  { %v2887_v22 = vpop.f32.mrb[11].mxu0  ;;  %v3896_v34 = vsel %vm933_vm2, %v690_v32, 0 }
 0x257   :  { %v671_v29 = vpop.permute.xlu1 %670 }
 0x258   :  { %v678_v30 = vpack.c.bf16 %v671_v29, %v671_v29 }
 0x25b   :  { %v674_v31 = vpop.permute.xlu1 %673 }
 0x25c   :  { %v679_v33 = vpack.c.bf16 %v674_v31, %v674_v31 }
 0x279   :  { %v3194_v23 = vpop.permute.xlu0 %3193 }
 0x27a   :  { %v3196_v24 = vunpack.i.h.bf16 %v3194_v23  ;;  %v3195_v25 = vunpack.i.l.bf16 %v3194_v23 }
 0x27c   :  { %v685_v26 = vpack.c.bf16 %v3196_v24, %v3196_v24  ;;  %v677_v27 = vpack.c.bf16 %v3195_v25, %v3195_v25 }
 0x27e   :  { %2897 = vmatmul.mubr.msk.bf16.vlgmr.msra.gmra.mrb[12].mxu1 %vm692_vm1, %v677_v27  ;;  %v786_v28 = vsel %vm692_vm1, %v685_v26, 0 }
 0x27f   :  { %2901 = vmatpush3.bf16.xpose.msra.mxu1 %v786_v28  ;;  %2902 = vmatprep.mubr.msk.bf16.mxu1 %vm3505_vm0, %v3504_v0 }
 0x280   :  { %2906 = vmatprep.subr.bf16.mxu1 %v3504_v0 }
 0x286   :  { %2903 = vmatmul.mubr.msk.bf16.vlgmr.msra.gmra.mrb[16].mxu1 %vm692_vm1, %v678_v30 }
 0x287   :  { %2907 = vmatpush3.bf16.xpose.msra.mxu1 %v786_v28  ;;  %2908 = vmatprep.mubr.msk.bf16.mxu1 %vm3505_vm0, %v3504_v0 }
 0x288   :  { %2912 = vmatprep.subr.bf16.mxu1 %v3504_v0 }
 0x28e   :  { %2909 = vmatmul.mubr.msk.bf16.vlgmr.msra.gmra.mrb[20].mxu1 %vm692_vm1, %v679_v33 }
 0x28f   :  { %2913 = vmatpush3.bf16.msra.mxu1 %v3896_v34  ;;  %2914 = vmatprep.mubr.msk.bf16.mxu1 %vm3505_vm0, %v3504_v0 }
 0x290   :  { %2918 = vmatprep.subr.bf16.mxu1 %v3504_v0 }
 0x2e2   :  { %v733_v38 = vpop.f32.mrb[8].mxu1 }
 0x2e3   :  { %v871_v39 = vmul.f32 0.17677669, %v733_v38  ;;  %v2892_v40 = vpop.f32.mrb[9].mxu1 }
 0x2e4   :  { %v736_v41 = vpop.f32.mrb[10].mxu1 }
 0x2e5   :  { %v2893_v42 = vpop.f32.mrb[11].mxu1  ;;  %v877_v43 = vsel %vm665_vm3, %v871_v39, -1e+30 }
 0x2e6   :  { %v882_v44 = vsel %vm881_vm4, %v877_v43, -inf }
 0x2e7   :  { %883 = vmax.xlane.f32.xlu1 %v882_v44 }
 0x351   :  { %v776_v45 = vpop.f32.mrb[12].mxu1 }
 0x352   :  { %v872_v46 = vmul.f32 0.17677669, %v776_v45  ;;  %v2898_v47 = vpop.f32.mrb[13].mxu1 }
 0x353   :  { %v779_v48 = vpop.f32.mrb[14].mxu1  ;;  %v3242_v47 = vld [vmem:[%s4369_s9] sm:$0xff]  }
 0x354   :  { %v2899_v49 = vpop.f32.mrb[15].mxu1  ;;  %v878_v50 = vsel %vm665_vm3, %v872_v46, -1e+30 }
 0x355   :  { %v885_v51 = vsel %vm881_vm4, %v878_v50, -inf  ;;  %v3243_v49 = vld [vmem:[%s4369_s9 + $0x8] sm:$0xff]  }
 0x356   :  { %886 = vmax.xlane.f32.xlu0 %v885_v51  ;;  %v3245_v51 = vld [vmem:[%s4369_s9 + $0x18] sm:$0xff]  }
 0x359   :  { %v822_v52 = vpop.f32.mrb[16].mxu1 }
 0x35a   :  { %v873_v53 = vmul.f32 0.17677669, %v822_v52  ;;  %v2904_v54 = vpop.f32.mrb[17].mxu1  ;;  %v3246_v52 = vld [vmem:[%s4369_s9 + $0x20] sm:$0xff]  }
 0x35b   :  { %v825_v55 = vpop.f32.mrb[18].mxu1 }
 0x35c   :  { %v2905_v56 = vpop.f32.mrb[19].mxu1  ;;  %v879_v57 = vsel %vm665_vm3, %v873_v53, -1e+30  ;;  %v3247_v53 = vld [vmem:[%s4369_s9 + $0x28] sm:$0xff]  }
 0x35d   :  { %v888_v58 = vsel %vm881_vm4, %v879_v57, -inf }
 0x35e   :  { %889 = vmax.xlane.f32.xlu1 %v888_v58  ;;  %v3248_v58 = vld [vmem:[%s4369_s9 + $0x30] sm:$0xff]  }
 0x361   :  { %v865_v59 = vpop.f32.mrb[20].mxu1 }
 0x362   :  { %v874_v60 = vmul.f32 0.17677669, %v865_v59  ;;  %v2910_v61 = vpop.f32.mrb[21].mxu1  ;;  %v3249_v59 = vld [vmem:[%s4369_s9 + $0x38] sm:$0xff]  }
 0x363   :  { %v868_v62 = vpop.f32.mrb[22].mxu1 }
 0x364   :  { %v2911_v63 = vpop.f32.mrb[23].mxu1  ;;  %v880_v1 = vsel %vm665_vm3, %v874_v60, -1e+30 }
 0x365   :  { %v891_v2 = vsel %vm881_vm4, %v880_v1, -inf }
 0x366   :  { %892 = vmax.xlane.f32.xlu1 %v891_v2 }
 0x374   :  { %v884_v4 = vpop.xlane.xlu1 %883 }
 0x375   :  { %v894_v5 = vsub.f32 %v877_v43, %v884_v4 }
 0x377   :  { %v898_v6 = vmul.f32 1.442695, %v894_v5 }
 0x379   :  { %3312 = vpow2.f32 %v898_v6 }
 0x383   :  { %v3313_v7 = vpop.eup %3312 }
 0x384   :  { %v906_v8 = vsel %vm881_vm4, %v3313_v7, 0.0 }
 0x385   :  { %907 = vadd.xlane.f32.xlu1 %v906_v8 }
 0x3e3   :  { %v887_v9 = vpop.xlane.xlu0 %886 }
 0x3e4   :  { %v895_v10 = vsub.f32 %v878_v50, %v887_v9  ;;  %v3244_v50 = vld [vmem:[%s4369_s9 + $0x10] sm:$0xff]  }
 0x3e6   :  { %v900_v11 = vmul.f32 1.442695, %v895_v10 }
 0x3e8   :  { %3314 = vpow2.f32 %v900_v11  ;;  %v1376_v11 = vld [vmem:[%s4372_s12] sm:$0xff] }
 0x3eb   :  { %v890_v12 = vpop.xlane.xlu1 %889 }
 0x3ec   :  { %v896_v13 = vsub.f32 %v879_v57, %v890_v12  ;;  %v1377_v12 = vld [vmem:[%s4372_s12 + $0x8] sm:$0xff] }
 0x3ee   :  { %v902_v14 = vmul.f32 1.442695, %v896_v13  ;;  %v3250_v13 = vld [vmem:[%s4374_s14] sm:$0xff]  }
 0x3f0   :  { %3316 = vpow2.f32 %v902_v14  ;;  %v3508_v14 = vmov 0.0|0.0  }
 0x3f2   :  { %v3315_v15 = vpop.eup %3314 }
 0x3f3   :  { %v893_v16 = vpop.xlane.xlu1 %892  ;;  %v909_v17 = vsel %vm881_vm4, %v3315_v15, 0.0 }
 0x3f4   :  { %v897_v18 = vsub.f32 %v880_v1, %v893_v16  ;;  %910 = vadd.xlane.f32.xlu1 %v909_v17  ;;  %v1378_v16 = vld [vmem:[%s4372_s12 + $0x10] sm:$0xff]  ;;  %v1379_v17 = vld [vmem:[%s4372_s12 + $0x18] sm:$0xff] }
 0x3f6   :  { %v904_v20 = vmul.f32 1.442695, %v897_v18  ;;  %v3251_v18 = vld [vmem:[%s4374_s14 + $0x8] sm:$0xff]  }
 0x3f8   :  { %3318 = vpow2.f32 %v904_v20  ;;  %v3155_v20 = vpack.c.bf16 %v1379_v17, %v1378_v16  ;;  %v3272_v16 = vld [vmem:[#allocation9 + $0x10] sm:$0xff]   ;;  %v3274_v17 = vld [vmem:[#allocation9 + $0x18] sm:$0xff]  }
 0x3fa   :  { %v3317_v21 = vpop.eup %3316 }
 0x3fb   :  { %v912_v22 = vsel %vm881_vm4, %v3317_v21, 0.0 }
 0x3fc   :  { %913 = vadd.xlane.f32.xlu0 %v912_v22  ;;  %v1381_v22 = vld [vmem:[%s4372_s12 + $0x28] sm:$0xff] }
 0x402   :  { %v3319_v23 = vpop.eup %3318 }
 0x403   :  { %v915_v24 = vsel %vm881_vm4, %v3319_v23, 0.0 }
 0x404   :  { %916 = vadd.xlane.f32.xlu1 %v915_v24 }
 0x412   :  { %v908_v25 = vpop.xlane.xlu1 %907  ;;  %687 = vrot.lane.b32.xlu0 %v3881_v19, %s3507_s10 }
 0x413   :  { %3320 = vrcp.f32 %v908_v25 }
 0x41d   :  { %v3321_v26 = vpop.eup %3320 }
 0x41e   :  { %v922_v27 = vmul.f32 %v3321_v26, %v3313_v7 }
 0x420   :  { %v926_v28 = vpack.c.bf16 %v922_v27, %v922_v27 }
 0x422   :  { %2915 = vmatmul.mubr.msk.bf16.vlgmr.msra.gmra.mrb[24].mxu1 %vm881_vm4, %v926_v28 }
 0x423   :  { %2919 = vmatpush3.bf16.msra.mxu1 %v3896_v34  ;;  %2920 = vmatprep.mubr.msk.bf16.mxu1 %vm3505_vm0, %v3504_v0 }
 0x424   :  { %2930 = vmatprep.subr.bf16.mxu1 %v3504_v0 }
 0x481   :  { %v911_v29 = vpop.xlane.xlu1 %910 }
 0x482   :  { %3322 = vrcp.f32 %v911_v29 }
 0x489   :  { %v914_v30 = vpop.xlane.xlu0 %913 }
 0x48a   :  { %3324 = vrcp.f32 %v914_v30 }
 0x48c   :  { %v3323_v31 = vpop.eup %3322 }
 0x48d   :  { %v923_v32 = vmul.f32 %v3323_v31, %v3315_v15  ;;  %v688_v19 = vpop.permute.xlu0 %687  ;;  %v3152_v15 = vpack.c.bf16 %v1377_v12, %v1376_v11  ;;  %v1382_v31 = vld [vmem:[%s4372_s12 + $0x30] sm:$0xff] }
 0x48e   :  { %v691_v33 = vpack.c.bf16 %v688_v19, %v688_v19 }
 0x48f   :  { %v927_v35 = vpack.c.bf16 %v923_v32, %v923_v32  ;;  %v1383_v32 = vld [vmem:[%s4372_s12 + $0x38] sm:$0xff] }
 0x490   :  { %v1024_v36 = vsel %vm933_vm2, %v691_v33, 0  ;;  %v3161_v19 = vpack.c.bf16 %v1383_v32, %v1382_v31  ;;  %v3253_v33 = vld [vmem:[%s4374_s14 + $0x18] sm:$0xff]  }
 0x491   :  { %v917_v38 = vpop.xlane.xlu1 %916  ;;  %2921 = vmatmul.mubr.msk.bf16.vlgmr.msra.gmra.mrb[28].mxu1 %vm881_vm4, %v927_v35  ;;  %2925 = vmatpush3.bf16.msra.mxu0 %v1024_v36  ;;  %v1385_v35 = vld [vmem:[%s4372_s12 + $0x48] sm:$0xff] }
 0x492   :  { %3326 = vrcp.f32 %v917_v38  ;;  %2931 = vmatpush3.bf16.msra.mxu1 %v1024_v36  ;;  %2932 = vmatprep.mubr.msk.bf16.mxu1 %vm3505_vm0, %v3504_v0  ;;  %v3254_v38 = vld [vmem:[%s4374_s14 + $0x20] sm:$0xff]  }
 0x493   :  { %2936 = vmatprep.subr.bf16.mxu0 %v3504_v0  ;;  %2956 = vmatprep.subr.bf16.mxu1 %v3504_v0 }
 0x494   :  { %v3325_v34 = vpop.eup %3324 }
 0x495   :  { %v924_v39 = vmul.f32 %v3325_v34, %v3317_v21  ;;  %v1380_v21 = vld [vmem:[%s4372_s12 + $0x20] sm:$0xff]  ;;  %v1386_v34 = vld [vmem:[%s4372_s12 + $0x50] sm:$0xff] }
 0x496   :  { %v3158_v24 = vpack.c.bf16 %v1381_v22, %v1380_v21 }
 0x497   :  { %v928_v40 = vpack.c.bf16 %v924_v39, %v924_v39  ;;  %v1387_v39 = vld [vmem:[%s4372_s12 + $0x58] sm:$0xff] }
 0x499   :  { %2927 = vmatmul.mubr.msk.bf16.vlgmr.msra.gmra.mrb[12].mxu0 %vm881_vm4, %v928_v40  ;;  %v3167_v40 = vpack.c.bf16 %v1387_v39, %v1386_v34  ;;  %v3275_v34 = vld [vmem:[%s4376_s16 + $0x48] sm:$0xff]  }
 0x49a   :  { %2952 = vmatprep.mubr.msk.bf16.mxu0 %vm3505_vm0, %v3504_v0  ;;  %2937 = vmatpush3.bf16.msra.mxu0 %v3242_v47  ;;  %v1391_v47 = vld [vmem:[%s4372_s12 + $0x78] sm:$0xff] }
 0x49b   :  { %2938 = vmatprep.subr.bf16.mxu0 %v3504_v0 }
 0x49c   :  { %v3327_v41 = vpop.eup %3326 }
 0x49d   :  { %v925_v42 = vmul.f32 %v3327_v41, %v3319_v23  ;;  %v3252_v23 = vld [vmem:[%s4374_s14 + $0x10] sm:$0xff]   ;;  %v3255_v41 = vld [vmem:[%s4374_s14 + $0x28] sm:$0xff]  }
 0x49e   :  { %2939 = vmatpush3.bf16.msra.mxu0 %v3243_v49  ;;  %v3257_v49 = vld [vmem:[%s4374_s14 + $0x38] sm:$0xff]  }
 0x49f   :  { %v929_v43 = vpack.c.bf16 %v925_v42, %v925_v42  ;;  %2940 = vmatprep.subr.bf16.mxu0 %v3504_v0  ;;  %v1388_v42 = vld [vmem:[%s4372_s12 + $0x60] sm:$0xff] }
 0x4a1   :  { %2933 = vmatmul.mubr.msk.bf16.vlgmr.msra.gmra.mrb[32].mxu1 %vm881_vm4, %v929_v43  ;;  %v1389_v43 = vld [vmem:[%s4372_s12 + $0x68] sm:$0xff] }
 0x4a2   :  { %2972 = vmatprep.mubr.msk.bf16.mxu1 %vm3505_vm0, %v3504_v0  ;;  %2941 = vmatpush3.bf16.msra.mxu0 %v3244_v50 }
 0x4a3   :  { %2942 = vmatprep.subr.bf16.mxu0 %v3504_v0  ;;  %2957 = vmatpush3.bf16.msra.mxu1 %v3250_v13 }
 0x4a4   :  { %2958 = vmatprep.subr.bf16.mxu1 %v3504_v0 }
 0x4a6   :  { %2943 = vmatpush3.bf16.msra.mxu0 %v3245_v51 }
 0x4a7   :  { %2944 = vmatprep.subr.bf16.mxu0 %v3504_v0  ;;  %2959 = vmatpush3.bf16.msra.mxu1 %v3251_v18 }
 0x4a8   :  { %2960 = vmatprep.subr.bf16.mxu1 %v3504_v0 }
 0x4aa   :  { %2945 = vmatpush3.bf16.msra.mxu0 %v3246_v52 }
 0x4ab   :  { %2946 = vmatprep.subr.bf16.mxu0 %v3504_v0  ;;  %2961 = vmatpush3.bf16.msra.mxu1 %v3252_v23 }
 0x4ac   :  { %2962 = vmatprep.subr.bf16.mxu1 %v3504_v0 }
 0x4ae   :  { %2947 = vmatpush3.bf16.msra.mxu0 %v3247_v53 }
 0x4af   :  { %2948 = vmatprep.subr.bf16.mxu0 %v3504_v0  ;;  %2963 = vmatpush3.bf16.msra.mxu1 %v3253_v33  ;;  %v3273_v33 = vld [vmem:[%s4376_s16 + $0x40] sm:$0xff]  }
 0x4b0   :  { %2964 = vmatprep.subr.bf16.mxu1 %v3504_v0 }
 0x4b2   :  { %2949 = vmatpush3.bf16.msra.mxu0 %v3248_v58 }
 0x4b3   :  { %2950 = vmatprep.subr.bf16.mxu0 %v3504_v0  ;;  %2965 = vmatpush3.bf16.msra.mxu1 %v3254_v38 }
 0x4b4   :  { %2966 = vmatprep.subr.bf16.mxu1 %v3504_v0 }
 0x4b6   :  { %2951 = vmatpush3.bf16.msra.mxu0 %v3249_v59  ;;  %v3259_v59 = vld [vmem:[%s4376_s16 + $0x8] sm:$0xff]  }
 0x4b7   :  { %3151 = vmatprep.subr.bf16.mxu0 %v3508_v14  ;;  %2967 = vmatpush3.bf16.msra.mxu1 %v3255_v41  ;;  %v3277_v41 = vld [vmem:[%s4376_s16 + $0x58] sm:$0xff]  }
 0x4b8   :  { %2968 = vmatprep.subr.bf16.mxu1 %v3504_v0 }
 0x4f5   :  { %v971_v44 = vpop.f32.mrb[24].mxu1 }
 0x4f6   :  { %1109 = vst.msk [vmem:[#allocation2] sm:$0xff] %vm692_vm1, %v971_v44  ;;  %v2916_v45 = vpop.f32.mrb[25].mxu1  ;;  %v3170_v44 = vpack.c.bf16 %v1389_v43, %v1388_v42  ;;  %v3278_v42 = vld [vmem:[%s4376_s16 + $0x60] sm:$0xff]   ;;  %v3279_v43 = vld [vmem:[%s4376_s16 + $0x68] sm:$0xff]  }
 0x4f7   :  { %v974_v46 = vpop.f32.mrb[26].mxu1  ;;  %v3256_v45 = vld [vmem:[%s4374_s14 + $0x30] sm:$0xff]  }
 0x4f8   :  { %v2917_v48 = vpop.f32.mrb[27].mxu1  ;;  %v1390_v46 = vld [vmem:[%s4372_s12 + $0x70] sm:$0xff]  ;;  %2969 = vmatpush3.bf16.msra.mxu1 %v3256_v45  ;;  %v3281_v45 = vld [vmem:[%s4376_s16 + $0x78] sm:$0xff]  }
 0x4f9   :  { %v3173_v48 = vpack.c.bf16 %v1391_v47, %v1390_v46  ;;  %2970 = vmatprep.subr.bf16.mxu1 %v3504_v0  ;;  %v3282_v46 = vld [vmem:[%s4377_s17 + $0x20] sm:$0xff]   ;;  %v3283_v47 = vld [vmem:[%s4377_s17 + $0x28] sm:$0xff]  }
 0x4fc   :  { %2971 = vmatpush3.bf16.msra.mxu1 %v3257_v49 }
 0x4fd   :  { %3011 = vmatprep.subr.bf16.mxu1 %v3504_v0 }
 0x564   :  { %v1014_v54 = vpop.f32.mrb[28].mxu1 }
 0x565   :  { %1111 = vrot.lane.b32.xlu1 %v1014_v54, %s3506_s8  ;;  %v2922_v55 = vpop.f32.mrb[29].mxu1  ;;  %v2487_v54 = vld [vmem:[#allocation6] ss:$0 sm:$0xff] }
 0x566   :  { %v1017_v56 = vpop.f32.mrb[30].mxu1 }
 0x567   :  { %v2923_v57 = vpop.f32.mrb[31].mxu1 }
 0x568   :  { %v3258_v57 = vld [vmem:[%s4376_s16] sm:$0xff]  }
 0x56c   :  { %v1060_v60 = vpop.f32.mrb[12].mxu0 }
 0x56d   :  { %1117 = vrot.lane.b32.xlu1 %v1060_v60, %s3502_s13  ;;  %v2928_v61 = vpop.f32.mrb[13].mxu0  ;;  %v3260_v60 = vld [vmem:[%s4376_s16 + $0x10] sm:$0xff]  }
 0x56e   :  { %v1063_v62 = vpop.f32.mrb[14].mxu0  ;;  %v3261_v61 = vld [vmem:[%s4376_s16 + $0x18] sm:$0xff]  }
 0x56f   :  { %v2929_v63 = vpop.f32.mrb[15].mxu0  ;;  %v3262_v62 = vld [vmem:[%s4376_s16 + $0x20] sm:$0xff]  }
 0x570   :  { %v3263_v63 = vld [vmem:[%s4376_s16 + $0x28] sm:$0xff]  }
 0x574   :  { %v1103_v1 = vpop.f32.mrb[32].mxu1 }
 0x575   :  { %1123 = vrot.lane.b32.xlu0 %v1103_v1, %s3507_s10  ;;  %v2934_v2 = vpop.f32.mrb[33].mxu1  ;;  %v3264_v1 = vld [vmem:[%s4376_s16 + $0x30] sm:$0xff]  }
 0x576   :  { %v1106_v4 = vpop.f32.mrb[34].mxu1  ;;  %v3265_v2 = vld [vmem:[%s4376_s16 + $0x38] sm:$0xff]  }
 0x577   :  { %v2935_v5 = vpop.f32.mrb[35].mxu1  ;;  %v3266_v4 = vld [vmem:[%s4377_s17] sm:$0xff]  }
 0x578   :  { %v3268_v5 = vld [vmem:[#allocation9] sm:$0xff]  }
 0x5d7   :  { %v1112_v6 = vpop.permute.xlu1 %1111 }
 0x5d8   :  { %1115 = vst.msk [vmem:[#allocation2] sm:$0xff] %vm1114_vm5, %v1112_v6  ;;  %v3267_v6 = vld [vmem:[%s4377_s17 + $0x8] sm:$0xff]  }
 0x5df   :  { %v1118_v7 = vpop.permute.xlu1 %1117 }
 0x5e0   :  { %1121 = vst.msk [vmem:[#allocation2] sm:$0xff] %vm1120_vm6, %v1118_v7  ;;  %v3270_v7 = vld [vmem:[#allocation9 + $0x8] sm:$0xff]  }
 0x5e7   :  { %v1124_v8 = vpop.permute.xlu0 %1123 }
 0x5e8   :  { %1127 = vst.msk [vmem:[#allocation2] sm:$0xff] %vm1126_vm7, %v1124_v8  ;;  %v3269_v8 = vld [vmem:[%s4377_s17 + $0x10] sm:$0xff]  }
 0x5ef   :  { %v1128_v9 = vld [vmem:[#allocation2] sm:$0xff] }
 0x5f0   :  { %v1129_v10 = vpack.c.bf16 %v1128_v9, %v1128_v9 }
 0x5f2   :  { %2953 = vmatmul.mubr.bf16.vlgmr.msra.gmra.mrb[16].mxu0 %v1129_v10 }
 0x5f3   :  { %3008 = vmatprep.mubr.msk.f32.mxu0 %vm3505_vm0, %v3504_v0  ;;  %3153 = vmatpush3.bf16.msra.mxu0 %v3152_v15  ;;  %v3271_v15 = vld [vmem:[%s4377_s17 + $0x18] sm:$0xff]  }
 0x5f4   :  { %3154 = vmatprep.subr.bf16.mxu0 %v3508_v14 }
 0x5f7   :  { %3156 = vmatpush3.bf16.msra.mxu0 %v3155_v20 }
 0x5f8   :  { %3157 = vmatprep.subr.bf16.mxu0 %v3508_v14 }
 0x5fb   :  { %3159 = vmatpush3.bf16.msra.mxu0 %v3158_v24 }
 0x5fc   :  { %3160 = vmatprep.subr.bf16.mxu0 %v3508_v14 }
 0x5ff   :  { %3162 = vmatpush3.bf16.msra.mxu0 %v3161_v19 }
 0x600   :  { %3163 = vmatprep.subr.bf16.mxu0 %v3508_v14 }
 0x6c5   :  { %v1228_v25 = vpop.f32.mrb[16].mxu0 }
 0x6c6   :  { %v1229_v26 = vadd.f32 %v1228_v25, %v3680_v3  ;;  %v2954_v27 = vpop.f32.mrb[17].mxu0  ;;  %v1384_v3 = vld [vmem:[%s4372_s12 + $0x40] sm:$0xff] }
 0x6c7   :  { %v1231_v28 = vpop.f32.mrb[18].mxu0  ;;  %v3164_v36 = vpack.c.bf16 %v1385_v35, %v1384_v3 }
 0x6c8   :  { %1234 = vst [vmem:[#allocation12] sm:$0xff] %v1229_v26  ;;  %v2955_v29 = vpop.f32.mrb[19].mxu0  ;;  %v1235_v30 = vmul.f32 %v1229_v26, %v1229_v26 }
 0x6c9   :  { %3165 = vmatpush3.bf16.msra.mxu0 %v3164_v36 }
 0x6ca   :  { %1236 = vadd.xlane.f32.xlu1 %v1235_v30  ;;  %3166 = vmatprep.subr.bf16.mxu0 %v3508_v14 }
 0x6cd   :  { %3168 = vmatpush3.bf16.msra.mxu0 %v3167_v40  ;;  %v3276_v40 = vld [vmem:[%s4376_s16 + $0x50] sm:$0xff]  }
 0x6ce   :  { %3169 = vmatprep.subr.bf16.mxu0 %v3508_v14 }
 0x6d1   :  { %3171 = vmatpush3.bf16.msra.mxu0 %v3170_v44  ;;  %v3280_v44 = vld [vmem:[%s4376_s16 + $0x70] sm:$0xff]  }
 0x6d2   :  { %3172 = vmatprep.subr.bf16.mxu0 %v3508_v14 }
 0x6d5   :  { %3174 = vmatpush3.bf16.msra.mxu0 %v3173_v48  ;;  %v3284_v48 = vld [vmem:[%s4377_s17 + $0x30] sm:$0xff]  }
 0x6d6   :  { %3031 = vmatprep.subr.bf16.mxu0 %v3504_v0 }
 0x757   :  { %v1237_v50 = vpop.xlane.xlu1 %1236 }
 0x758   :  { %v1238_v51 = vmul.f32 0.0078125, %v1237_v50 }
 0x75a   :  { %v1239_v52 = vadd.f32 1e-05, %v1238_v51 }
 0x75c   :  { %3328 = vrsqrt.f32 %v1239_v52 }
 0x766   :  { %v3329_v53 = vpop.eup %3328 }
 0x767   :  { %v1241_v55 = vmul.f32 %v3329_v53, %v1229_v26 }
 0x769   :  { %v1249_v56 = vmul.f32 %v2487_v54, %v1241_v55 }
 0x76b   :  { %v4070_v58 = vpack.c.bf16 %v1249_v56, %v1249_v56  ;;  %3009 = vmatmul.mubr.f32.vlgmr.msra.gmra.mrb[20].mxu0 %v1249_v56 }
 0x76c   :  { %3039 = vmatprep.mubr.msk.bf16.mxu0 %vm3505_vm0, %v3504_v0  ;;  %3032 = vmatpush3.bf16.msra.mxu0 %v3266_v4 }
 0x76d   :  { %2973 = vmatmul.mubr.bf16.vlgmr.msra.gmra.mrb[36].mxu1 %v4070_v58  ;;  %3033 = vmatprep.subr.bf16.mxu0 %v3504_v0 }
 0x76e   :  { %3012 = vmatpush3.bf16.msra.mxu1 %v3258_v57  ;;  %3027 = vmatprep.mubr.msk.bf16.mxu1 %vm3505_vm0, %v3504_v0  ;;  %v3285_v57 = vld [vmem:[%s4377_s17 + $0x38] sm:$0xff]  }
 0x76f   :  { %3013 = vmatprep.subr.bf16.mxu1 %v3504_v0 }
 0x770   :  { %3034 = vmatpush3.bf16.msra.mxu0 %v3267_v6 }
 0x771   :  { %3035 = vmatprep.subr.bf16.mxu0 %v3504_v0 }
 0x772   :  { %3014 = vmatpush3.bf16.msra.mxu1 %v3259_v59 }
 0x773   :  { %3015 = vmatprep.subr.bf16.mxu1 %v3504_v0 }
 0x774   :  { %3036 = vmatpush3.bf16.msra.mxu0 %v3269_v8 }
 0x775   :  { %3037 = vmatprep.subr.bf16.mxu0 %v3504_v0 }
 0x776   :  { %3016 = vmatpush3.bf16.msra.mxu1 %v3260_v60 }
 0x777   :  { %3017 = vmatprep.subr.bf16.mxu1 %v3504_v0 }
 0x778   :  { %3038 = vmatpush3.bf16.msra.mxu0 %v3271_v15  ;;  %v3290_v15 = vld [vmem:[%s4376_s16 + $0xa0] sm:$0xff]  }
 0x779   :  { %3055 = vmatprep.subr.bf16.mxu0 %v3504_v0 }
 0x77a   :  { %3018 = vmatpush3.bf16.msra.mxu1 %v3261_v61 }
 0x77b   :  { %3019 = vmatprep.subr.bf16.mxu1 %v3504_v0 }
 0x77e   :  { %3020 = vmatpush3.bf16.msra.mxu1 %v3262_v62 }
 0x77f   :  { %3021 = vmatprep.subr.bf16.mxu1 %v3504_v0 }
 0x782   :  { %3022 = vmatpush3.bf16.msra.mxu1 %v3263_v63 }
 0x783   :  { %3023 = vmatprep.subr.bf16.mxu1 %v3504_v0 }
 0x786   :  { %3024 = vmatpush3.bf16.msra.mxu1 %v3264_v1 }
 0x787   :  { %3025 = vmatprep.subr.bf16.mxu1 %v3504_v0 }
 0x78a   :  { %3026 = vmatpush3.bf16.msra.mxu1 %v3265_v2 }
 0x78b   :  { %3043 = vmatprep.subr.bf16.mxu1 %v3504_v0 }
 0x78d   :  { %3028 = vmatmul.mubr.bf16.vlgmr.msra.gmra.mrb[40].mxu1 %v4070_v58 }
 0x78e   :  { %3051 = vmatprep.mubr.msk.bf16.mxu1 %vm3505_vm0, %v3504_v0  ;;  %3044 = vmatpush3.bf16.msra.mxu1 %v3268_v5 }
 0x78f   :  { %3045 = vmatprep.subr.bf16.mxu1 %v3504_v0 }
 0x792   :  { %3046 = vmatpush3.bf16.msra.mxu1 %v3270_v7 }
 0x793   :  { %3047 = vmatprep.subr.bf16.mxu1 %v3504_v0 }
 0x796   :  { %3048 = vmatpush3.bf16.msra.mxu1 %v3272_v16  ;;  %v3291_v16 = vld [vmem:[%s4376_s16 + $0xa8] sm:$0xff]  }
 0x797   :  { %3049 = vmatprep.subr.bf16.mxu1 %v3504_v0 }
 0x79a   :  { %3050 = vmatpush3.bf16.msra.mxu1 %v3274_v17  ;;  %v3292_v17 = vld [vmem:[%s4376_s16 + $0xb0] sm:$0xff]  }
 0x79b   :  { %3075 = vmatprep.subr.bf16.mxu1 %v3504_v0 }
 0x83e   :  { %v4123_v9 = vpop.f32.mrb[20].mxu0 }
 0x83f   :  { %v3010_v10 = vpop.f32.mrb[21].mxu0  ;;  %v1463_v63 = vsel %vm1462_vm9, %v4123_v9, -inf }
 0x840   :  { %v1349_v11 = vpop.f32.mrb[36].mxu1  ;;  %v3286_v10 = vld [vmem:[%s4376_s16 + $0x80] sm:$0xff]  }
 0x841   :  { %v2974_v12 = vpop.f32.mrb[37].mxu1  ;;  %v2496_v24 = vmul.f32 -1.442695, %v1349_v11 }
 0x842   :  { %v1352_v13 = vpop.f32.mrb[38].mxu1  ;;  %v3287_v12 = vld [vmem:[%s4376_s16 + $0x88] sm:$0xff]  }
 0x843   :  { %v2975_v14 = vpop.f32.mrb[39].mxu1  ;;  %v3288_v13 = vld [vmem:[%s4376_s16 + $0x90] sm:$0xff]  }
 0x844   :  { %v3289_v14 = vld [vmem:[%s4376_s16 + $0x98] sm:$0xff]  }
 0x860   :  { %v1630_v18 = vpop.f32.mrb[40].mxu1 }
 0x861   :  { %1644 = vrot.lane.b32.xlu0 %v1630_v18, %s3502_s13  ;;  %v3029_v20 = vpop.f32.mrb[41].mxu1  ;;  %v2506_v23 = vmul.f32 -1.442695, %v1630_v18 }
 0x862   :  { %v1633_v21 = vpop.f32.mrb[42].mxu1 }
 0x863   :  { %v3030_v22 = vpop.f32.mrb[43].mxu1  ;;  %3330 = vpow2.f32 %v2506_v23 }
 0x864   :  { %3332 = vpow2.f32 %v2496_v24 }
 0x865   :  { %1363 = vrot.lane.b32.xlu0 %v1349_v11, %s3502_s13 }
 0x86d   :  { %v3331_v25 = vpop.eup %3330 }
 0x86e   :  { %v1639_v26 = vadd.f32 1.0, %v3331_v25  ;;  %v3333_v27 = vpop.eup %3332  ;;  %v3294_v25 = vld [vmem:[%s4377_s17 + $0x40] sm:$0xff]  }
 0x86f   :  { %v1358_v28 = vadd.f32 1.0, %v3333_v27 }
 0x870   :  { %3334 = vrcp.f32 %v1639_v26  ;;  %v3295_v26 = vld [vmem:[%s4377_s17 + $0x48] sm:$0xff]  }
 0x871   :  { %3336 = vrcp.f32 %v1358_v28 }
 0x87a   :  { %v3335_v29 = vpop.eup %3334 }
 0x87b   :  { %v1642_v30 = vmul.f32 %v3335_v29, %v1630_v18  ;;  %v3337_v31 = vpop.eup %3336  ;;  %v3293_v18 = vld [vmem:[%s4376_s16 + $0xb8] sm:$0xff]  }
 0x87c   :  { %v1361_v35 = vmul.f32 %v3337_v31, %v1349_v11 }
 0x8d3   :  { %v1645_v32 = vpop.permute.xlu0 %1644 }
 0x8d4   :  { %v1647_v19 = vmul.f32 %v1645_v32, %v1642_v30  ;;  %v2497_v32 = vld [vmem:[#allocation8] ss:$0 sm:$0xff] }
 0x8d6   :  { %v1648_v3 = vpack.c.bf16 %v1647_v19, %v1647_v19 }
 0x8d7   :  { %v1364_v36 = vpop.permute.xlu0 %1363 }
 0x8d8   :  { %v1366_v38 = vmul.f32 %v1364_v36, %v1361_v35  ;;  %3040 = vmatmul.mubr.msk.bf16.vlgmr.msra.gmra.mrb[24].mxu0 %vm1681_vm8, %v1648_v3  ;;  %v3296_v35 = vld [vmem:[%s4377_s17 + $0x50] sm:$0xff]  }
 0x8d9   :  { %3056 = vmatpush3.bf16.msra.mxu0 %v3273_v33  ;;  %3071 = vmatprep.mubr.msk.bf16.mxu0 %vm3505_vm0, %v3504_v0 }
 0x8da   :  { %v1367_v39 = vpack.c.bf16 %v1366_v38, %v1366_v38  ;;  %3057 = vmatprep.subr.bf16.mxu0 %v3504_v0 }
 0x8dc   :  { %3052 = vmatmul.mubr.msk.bf16.vlgmr.msra.gmra.mrb[44].mxu1 %vm1681_vm8, %v1367_v39  ;;  %v3297_v39 = vld [vmem:[%s4377_s17 + $0x58] sm:$0xff]  }
 0x8dd   :  { %3058 = vmatpush3.bf16.msra.mxu0 %v3275_v34  ;;  %3083 = vmatprep.mubr.msk.bf16.mxu1 %vm3505_vm0, %v3504_v0 }
 0x8de   :  { %3059 = vmatprep.subr.bf16.mxu0 %v3504_v0  ;;  %3076 = vmatpush3.bf16.msra.mxu1 %v3282_v46 }
 0x8df   :  { %3077 = vmatprep.subr.bf16.mxu1 %v3504_v0 }
 0x8e1   :  { %3060 = vmatpush3.bf16.msra.mxu0 %v3276_v40 }
 0x8e2   :  { %3061 = vmatprep.subr.bf16.mxu0 %v3504_v0  ;;  %3078 = vmatpush3.bf16.msra.mxu1 %v3283_v47 }
 0x8e3   :  { %3079 = vmatprep.subr.bf16.mxu1 %v3504_v0 }
 0x8e5   :  { %3062 = vmatpush3.bf16.msra.mxu0 %v3277_v41 }
 0x8e6   :  { %3063 = vmatprep.subr.bf16.mxu0 %v3504_v0  ;;  %3080 = vmatpush3.bf16.msra.mxu1 %v3284_v48 }
 0x8e7   :  { %3081 = vmatprep.subr.bf16.mxu1 %v3504_v0 }
 0x8e9   :  { %3064 = vmatpush3.bf16.msra.mxu0 %v3278_v42 }
 0x8ea   :  { %3065 = vmatprep.subr.bf16.mxu0 %v3504_v0  ;;  %3082 = vmatpush3.bf16.msra.mxu1 %v3285_v57  ;;  %v3299_v57 = vld [vmem:[%s4376_s16 + $0xc8] sm:$0xff]  }
 0x8eb   :  { %3087 = vmatprep.subr.bf16.mxu1 %v3504_v0 }
 0x8ed   :  { %3066 = vmatpush3.bf16.msra.mxu0 %v3279_v43 }
 0x8ee   :  { %3067 = vmatprep.subr.bf16.mxu0 %v3504_v0 }
 0x8f1   :  { %3068 = vmatpush3.bf16.msra.mxu0 %v3280_v44 }
 0x8f2   :  { %3069 = vmatprep.subr.bf16.mxu0 %v3504_v0 }
 0x8f5   :  { %3070 = vmatpush3.bf16.msra.mxu0 %v3281_v45 }
 0x8f6   :  { %3107 = vmatprep.subr.bf16.mxu0 %v3504_v0 }
 0x8f8   :  { %3072 = vmatmul.mubr.bf16.vlgmr.msra.gmra.mrb[28].mxu0 %v4070_v58 }
 0x8f9   :  { %3115 = vmatprep.mubr.msk.bf16.mxu0 %vm3505_vm0, %v3504_v0  ;;  %3108 = vmatpush3.bf16.msra.mxu0 %v3294_v25 }
 0x8fa   :  { %3109 = vmatprep.subr.bf16.mxu0 %v3504_v0 }
 0x8fd   :  { %3110 = vmatpush3.bf16.msra.mxu0 %v3295_v26 }
 0x8fe   :  { %3111 = vmatprep.subr.bf16.mxu0 %v3504_v0 }
 0x901   :  { %3112 = vmatpush3.bf16.msra.mxu0 %v3296_v35 }
 0x902   :  { %3113 = vmatprep.subr.bf16.mxu0 %v3504_v0 }
 0x905   :  { %3114 = vmatpush3.bf16.msra.mxu0 %v3297_v39 }
 0x906   :  { %3119 = vmatprep.subr.bf16.mxu0 %v3504_v0 }
 0x9ab   :  { %v4186_v49 = vpop.f32.mrb[24].mxu0 }
 0x9ac   :  { %v3041_v50 = vpop.f32.mrb[25].mxu0 }
 0x9ad   :  { %v1722_v51 = vpop.f32.mrb[26].mxu0 }
 0x9ae   :  { %v3042_v52 = vpop.f32.mrb[27].mxu0 }
 0x9af   :  { %v4188_v53 = vpop.f32.mrb[44].mxu1 }
 0x9b0   :  { %v3053_v54 = vpop.f32.mrb[45].mxu1 }
 0x9b1   :  { %v1795_v55 = vpop.f32.mrb[46].mxu1 }
 0x9b2   :  { %v3054_v56 = vpop.f32.mrb[47].mxu1  ;;  %v3298_v55 = vld [vmem:[%s4376_s16 + $0xc0] sm:$0xff]  }
 0x9cb   :  { %v1897_v59 = vpop.f32.mrb[28].mxu0 }
 0x9cc   :  { %1911 = vrot.lane.b32.xlu0 %v1897_v59, %s3502_s13  ;;  %v3073_v60 = vpop.f32.mrb[29].mxu0  ;;  %v2541_v1 = vmul.f32 -1.442695, %v1897_v59 }
 0x9cd   :  { %v1900_v61 = vpop.f32.mrb[30].mxu0  ;;  %v3301_v60 = vld [vmem:[%s4376_s16 + $0xd8] sm:$0xff]  }
 0x9ce   :  { %v3074_v62 = vpop.f32.mrb[31].mxu0  ;;  %3338 = vpow2.f32 %v2541_v1  ;;  %v3302_v61 = vld [vmem:[%s4376_s16 + $0xe0] sm:$0xff]   ;;  %v3305_v1 = vld [vmem:[%s4376_s16 + $0xf8] sm:$0xff]  }
 0x9cf   :  { %v3303_v62 = vld [vmem:[%s4376_s16 + $0xe8] sm:$0xff]  }
 0x9d8   :  { %v3339_v2 = vpop.eup %3338 }
 0x9d9   :  { %v1906_v4 = vadd.f32 1.0, %v3339_v2 }
 0x9db   :  { %3340 = vrcp.f32 %v1906_v4 }
 0x9e5   :  { %v3341_v5 = vpop.eup %3340 }
 0x9e6   :  { %v1909_v6 = vmul.f32 %v3341_v5, %v1897_v59  ;;  %v3300_v59 = vld [vmem:[%s4376_s16 + $0xd0] sm:$0xff]  }
 0x9eb   :  { %1464 = vmax.xlane.f32.xlu0 %v1463_v63  ;;  %v3304_v63 = vld [vmem:[%s4376_s16 + $0xf0] sm:$0xff]  }
 0xa3e   :  { %v1912_v7 = vpop.permute.xlu0 %1911 }
 0xa3f   :  { %v1914_v8 = vmul.f32 %v1912_v7, %v1909_v6 }
 0xa41   :  { %v1915_v11 = vpack.c.bf16 %v1914_v8, %v1914_v8 }
 0xa43   :  { %3084 = vmatmul.mubr.msk.bf16.vlgmr.msra.gmra.mrb[48].mxu1 %vm1681_vm8, %v1915_v11 }
 0xa44   :  { %3088 = vmatpush3.bf16.msra.mxu1 %v3286_v10  ;;  %3103 = vmatprep.mubr.msk.bf16.mxu1 %vm3505_vm0, %v3504_v0 }
 0xa45   :  { %3089 = vmatprep.subr.bf16.mxu1 %v3504_v0 }
 0xa48   :  { %3090 = vmatpush3.bf16.msra.mxu1 %v3287_v12 }
 0xa49   :  { %3091 = vmatprep.subr.bf16.mxu1 %v3504_v0 }
 0xa4c   :  { %3092 = vmatpush3.bf16.msra.mxu1 %v3288_v13 }
 0xa4d   :  { %3093 = vmatprep.subr.bf16.mxu1 %v3504_v0 }
 0xa50   :  { %3094 = vmatpush3.bf16.msra.mxu1 %v3289_v14 }
 0xa51   :  { %3095 = vmatprep.subr.bf16.mxu1 %v3504_v0 }
 0xa54   :  { %3096 = vmatpush3.bf16.msra.mxu1 %v3290_v15 }
 0xa55   :  { %3097 = vmatprep.subr.bf16.mxu1 %v3504_v0 }
 0xa58   :  { %3098 = vmatpush3.bf16.msra.mxu1 %v3291_v16 }
 0xa59   :  { %3099 = vmatprep.subr.bf16.mxu1 %v3504_v0 }
 0xa5c   :  { %3100 = vmatpush3.bf16.msra.mxu1 %v3292_v17 }
 0xa5d   :  { %3101 = vmatprep.subr.bf16.mxu1 %v3504_v0 }
 0xa60   :  { %3102 = vmatpush3.bf16.msra.mxu1 %v3293_v18 }
 0xa61   :  { %3139 = vmatprep.subr.bf16.mxu1 %v3504_v0 }
 0xa63   :  { %3104 = vmatmul.mubr.bf16.vlgmr.msra.gmra.mrb[52].mxu1 %v4070_v58 }
 0xa64   :  { %3147 = vmatprep.mubr.msk.bf16.mxu1 %vm3505_vm0, %v3504_v0 }
 0xa78   :  { %v1465_v20 = vpop.xlane.xlu0 %1464 }
 0xa79   :  { %v1466_v21 = vsub.f32 %v4123_v9, %v1465_v20 }
 0xa7b   :  { %v1467_v22 = vmul.f32 1.442695, %v1466_v21 }
 0xa7d   :  { %3342 = vpow2.f32 %v1467_v22 }
 0xa87   :  { %v3343_v23 = vpop.eup %3342 }
 0xa88   :  { %v1469_v24 = vsel %vm1462_vm9, %v3343_v23, 0.0 }
 0xa89   :  { %1470 = vadd.xlane.f32.xlu1 %v1469_v24  ;;  %v3307_v24 = vld [vmem:[%s4377_s17 + $0x68] sm:$0xff]  }
 0xb16   :  { %v1471_v9 = vpop.xlane.xlu1 %1470  ;;  %v4245_v27 = vpop.f32.mrb[48].mxu1 }
 0xb17   :  { %3344 = vrcp.f32 %v1471_v9  ;;  %v3085_v28 = vpop.f32.mrb[49].mxu1 }
 0xb18   :  { %v1989_v29 = vpop.f32.mrb[50].mxu1 }
 0xb19   :  { %v3086_v30 = vpop.f32.mrb[51].mxu1 }
 0xb1a   :  { %v3308_v30 = vld [vmem:[%s4377_s17 + $0x70] sm:$0xff]  }
 0xb21   :  { %v3345_v31 = vpop.eup %3344 }
 0xb22   :  { %v4247_v19 = vmul.f32 %v3345_v31, %v3343_v23  ;;  %v3306_v23 = vld [vmem:[%s4377_s17 + $0x60] sm:$0xff]   ;;  %v3309_v31 = vld [vmem:[%s4377_s17 + $0x78] sm:$0xff]   ;;  %s3513_s17 = smov [#allocation12]  }
 0xb23   :  { %3140 = vmatpush3.bf16.msra.mxu1 %v3306_v23 }
 0xb24   :  { %v4250_v33 = vadd.f32 %v2497_v32, %v4247_v19  ;;  %3141 = vmatprep.subr.bf16.mxu1 %v3504_v0 }
 0xb26   :  { %v1482_v3 = vsel %vm1462_vm9, %v4250_v33, -inf }
 0xb27   :  { %1483 = vmax.xlane.f32.xlu1 %v1482_v3  ;;  %3142 = vmatpush3.bf16.msra.mxu1 %v3307_v24 }
 0xb28   :  { %3143 = vmatprep.subr.bf16.mxu1 %v3504_v0 }
 0xb2b   :  { %3144 = vmatpush3.bf16.msra.mxu1 %v3308_v30 }
 0xb2c   :  { %3145 = vmatprep.subr.bf16.mxu1 %v3504_v0 }
 0xb2f   :  { %3146 = vmatpush3.bf16.msra.mxu1 %v3309_v31 }
 0xb36   :  { %v2097_v36 = vpop.f32.mrb[52].mxu1 }
 0xb37   :  { %v3105_v38 = vpop.f32.mrb[53].mxu1  ;;  %v2579_v41 = vmul.f32 -1.442695, %v2097_v36 }
 0xb38   :  { %v2100_v34 = vpop.f32.mrb[54].mxu1  ;;  %2111 = vrot.lane.b32.xlu1 %v2097_v36, %s3502_s13 }
 0xb39   :  { %v3106_v40 = vpop.f32.mrb[55].mxu1  ;;  %3346 = vpow2.f32 %v2579_v41 }
 0xb43   :  { %v3347_v42 = vpop.eup %3346 }
 0xb44   :  { %v2106_v43 = vadd.f32 1.0, %v3347_v42 }
 0xb46   :  { %3348 = vrcp.f32 %v2106_v43 }
 0xb50   :  { %v3349_v44 = vpop.eup %3348 }
 0xb51   :  { %v2109_v48 = vmul.f32 %v3349_v44, %v2097_v36 }
 0xbb4   :  { %v1484_v45 = vpop.xlane.xlu1 %1483 }
 0xbb5   :  { %vm1485_vm10 = vcmp.eq.f32.partialorder %v4250_v33, %v1484_v45 }
 0xbb6   :  { %v1486_v46 = vsel %vm1485_vm10, %v3902_v37, 4 }
 0xbb7   :  { %v1487_v47 = vsel %vm1462_vm9, %v1486_v46, 2147483647 }
 0xbb8   :  { %v2112_v50 = vpop.permute.xlu1 %2111  ;;  %v1489_v51 = vshra.s32 %v1487_v47, 16  ;;  %v1488_v2 = vand.u32 65535, %v1487_v47 }
 0xbb9   :  { %v2114_v52 = vmul.f32 %v2112_v50, %v2109_v48 }
 0xbba   :  { %v1491_v54 = vcvt.s32.f32 %v1489_v51  ;;  %v1490_v5 = vcvt.s32.f32 %v1488_v2  ;;  %v3509_v51 = vmov 1  }
 0xbbb   :  { %v2115_v56 = vpack.c.bf16 %v2114_v52, %v2114_v52  ;;  %3198 = vset.pattern.permute.xlu0 %v3509_v51  ;;  %v3510_v52 = vmov 0  }
 0xbbc   :  { %1492 = vmin.xlane.f32.xlu0 %v1491_v54  ;;  %3197 = vset.pattern.permute.xlu1 %v3510_v52 }
 0xbbd   :  { %3116 = vmatmul.mubr.msk.bf16.vlgmr.msra.gmra.mrb[32].mxu0 %vm1681_vm8, %v2115_v56 }
 0xbbe   :  { %3120 = vmatpush3.bf16.msra.mxu0 %v3298_v55  ;;  %3135 = vmatprep.mubr.msk.bf16.mxu0 %vm3505_vm0, %v3504_v0 }
 0xbbf   :  { %3121 = vmatprep.subr.bf16.mxu0 %v3504_v0 }
 0xbc2   :  { %3122 = vmatpush3.bf16.msra.mxu0 %v3299_v57 }
 0xbc3   :  { %3123 = vmatprep.subr.bf16.mxu0 %v3504_v0 }
 0xbc6   :  { %3124 = vmatpush3.bf16.msra.mxu0 %v3300_v59 }
 0xbc7   :  { %3125 = vmatprep.subr.bf16.mxu0 %v3504_v0 }
 0xbca   :  { %3126 = vmatpush3.bf16.msra.mxu0 %v3301_v60 }
 0xbcb   :  { %3127 = vmatprep.subr.bf16.mxu0 %v3504_v0 }
 0xbce   :  { %3128 = vmatpush3.bf16.msra.mxu0 %v3302_v61 }
 0xbcf   :  { %3129 = vmatprep.subr.bf16.mxu0 %v3504_v0 }
 0xbd2   :  { %3130 = vmatpush3.bf16.msra.mxu0 %v3303_v62 }
 0xbd3   :  { %3131 = vmatprep.subr.bf16.mxu0 %v3504_v0 }
 0xbd6   :  { %3132 = vmatpush3.bf16.msra.mxu0 %v3304_v63 }
 0xbd7   :  { %3133 = vmatprep.subr.bf16.mxu0 %v3504_v0 }
 0xbda   :  { %3134 = vmatpush3.bf16.msra.mxu0 %v3305_v1 }
 0xbdd   :  { %3136 = vmatmul.mubr.bf16.vlgmr.msra.gmra.mrb[36].mxu0 %v4070_v58 }
 0xc49   :  { %v1493_v4 = vpop.xlane.xlu0 %1492 }
 0xc4a   :  { %vm1494_vm11 = vcmp.eq.f32.partialorder %v1491_v54, %v1493_v4  ;;  %v1499_v16 = vcvt.f32.s32 %v1493_v4 }
 0xc4b   :  { %v1495_v6 = vsel %vm1494_vm11, %v1490_v5, inf }
 0xc4c   :  { %1496 = vmin.xlane.f32.xlu0 %v1495_v6  ;;  %v1500_v18 = vshll.u32 %v1499_v16, 16 }
 0xc90   :  { %v4301_v7 = vpop.f32.mrb[32].mxu0 }
 0xc91   :  { %v3117_v8 = vpop.f32.mrb[33].mxu0 }
 0xc92   :  { %v2189_v10 = vpop.f32.mrb[34].mxu0 }
 0xc93   :  { %v3118_v11 = vpop.f32.mrb[35].mxu0 }
 0xcb0   :  { %v2297_v12 = vpop.f32.mrb[36].mxu0 }
 0xcb1   :  { %v3137_v13 = vpop.f32.mrb[37].mxu0  ;;  %v2617_v32 = vmul.f32 -1.442695, %v2297_v12 }
 0xcb2   :  { %v2300_v14 = vpop.f32.mrb[38].mxu0 }
 0xcb3   :  { %v3138_v15 = vpop.f32.mrb[39].mxu0  ;;  %3350 = vpow2.f32 %v2617_v32 }
 0xcd9   :  { %v1497_v17 = vpop.xlane.xlu0 %1496 }
 0xcda   :  { %v1498_v20 = vcvt.f32.s32 %v1497_v17 }
 0xcdc   :  { %v1501_v58 = vadd.s32 %v1500_v18, %v1498_v20 }
 0xcde   :  { %vm1502_vm12 = vcmp.eq.s32.totalorder %v3902_v37, %v1501_v58 }
 0xcdf   :  { %v1503_v21 = vsel %vm1502_vm12, -1e+30, %v4250_v33  ;;  %v3351_v33 = vpop.eup %3350 }
 0xce0   :  { %v1504_v22 = vsel %vm1462_vm9, %v1503_v21, -inf  ;;  %v2306_v3 = vadd.f32 1.0, %v3351_v33 }
 0xce1   :  { %1505 = vmax.xlane.f32.xlu0 %v1504_v22 }
 0xce2   :  { %3352 = vrcp.f32 %v2306_v3 }
 0xcec   :  { %v3353_v36 = vpop.eup %3352 }
 0xced   :  { %v2309_v0 = vmul.f32 %v3353_v36, %v2297_v12 }
 0xd6e   :  { %v1506_v25 = vpop.xlane.xlu0 %1505 }
 0xd6f   :  { %vm1507_vm13 = vcmp.eq.f32.partialorder %v1503_v21, %v1506_v25 }
 0xd70   :  { %v1508_v26 = vsel %vm1507_vm13, %v3902_v37, 4 }
 0xd71   :  { %v1509_v9 = vsel %vm1462_vm9, %v1508_v26, 2147483647 }
 0xd72   :  { %v1511_v28 = vshra.s32 %v1509_v9, 16  ;;  %v1510_v35 = vand.u32 65535, %v1509_v9 }
 0xd74   :  { %v1513_v29 = vcvt.s32.f32 %v1511_v28  ;;  %v1512_v34 = vcvt.s32.f32 %v1510_v35 }
 0xd76   :  { %1514 = vmin.xlane.f32.xlu0 %v1513_v29 }
 0xd8c   :  { %2311 = vrot.lane.b32.xlu0 %v2297_v12, %s3502_s13  ;;  %s2415_s13 = sshll.u32 %s3513_s17, 4  ;;  %s2416_s13 = int_to_ptr.vmem [resolvable:$true] %s2415_s13 }
 0xd8d   :  { %s3444_s4 = scalar_lea.vmem %s2416_s13, 128  ;;  %p3449_p5 = scmp.lt.s32.totalorder %s2416_s13, %s2416_s13 }
 0xd8e   :  { %p3445_p4 = scmp.ne.s32.totalorder %s2416_s13, %s3444_s4  ;;  %p3450_p6 = scmp.lt.s32.totalorder %s3444_s4, %s3444_s4 }
 0xd90   :  { %p3451_p7 = por %p3450_p6, %p3449_p5 }
 0xd92   :  { %p3452_p8 = pnand %p3451_p7, %p3445_p4 }
 0xe03   :  { %v1515_v38 = vpop.xlane.xlu0 %1514 }
 0xe04   :  { %vm1516_vm14 = vcmp.eq.f32.partialorder %v1513_v29, %v1515_v38  ;;  %v1521_v43 = vcvt.f32.s32 %v1515_v38 }
 0xe05   :  { %v1517_v39 = vsel %vm1516_vm14, %v1512_v34, inf }
 0xe06   :  { %1518 = vmin.xlane.f32.xlu1 %v1517_v39  ;;  %v1522_v45 = vshll.u32 %v1521_v43, 16 }
 0xe07   :  { %v2312_v40 = vpop.permute.xlu0 %2311 }
 0xe08   :  { %v2314_v41 = vmul.f32 %v2312_v40, %v2309_v0 }
 0xe0a   :  { %v2315_v42 = vpack.c.bf16 %v2314_v41, %v2314_v41 }
 0xe0c   :  { %3148 = vmatmul.mubr.msk.bf16.vlgmr.msra.gmra.mrb[56].mxu1 %vm1681_vm8, %v2315_v42 }
 0xe93   :  { %v1519_v44 = vpop.xlane.xlu1 %1518 }
 0xe94   :  { %v1520_v46 = vcvt.f32.s32 %v1519_v44 }
 0xe96   :  { %v1523_v47 = vadd.s32 %v1522_v45, %v1520_v46 }
 0xe98   :  { %vm1524_vm15 = vcmp.eq.s32.totalorder %v3902_v37, %v1523_v47  ;;  %v3511_v37 = vmov 2  }
 0xe99   :  { %vm1525_vm0 = vmor %vm1502_vm12, %vm1524_vm15 }
 0xe9a   :  { %v1526_v48 = vsel %vm1525_vm0, %v4247_v19, 0.0  ;;  %v3512_v19 = vmov 3  }
 0xe9b   :  { %v1527_v50 = vsel %vm1462_vm9, %v1526_v48, 0.0 }
 0xe9c   :  { %1528 = vadd.xlane.f32.xlu0 %v1527_v50 }
 0xedf   :  { %v2386_v54 = vpop.f32.mrb[56].mxu1 }
 0xee0   :  { %v3149_v55 = vpop.f32.mrb[57].mxu1 }
 0xee1   :  { %v2389_v56 = vpop.f32.mrb[58].mxu1 }
 0xee2   :  { %v3150_v57 = vpop.f32.mrb[59].mxu1 }
 0xf29   :  { %v1529_v59 = vpop.xlane.xlu0 %1528 }
 0xf2a   :  { %3354 = vrcp.f32 %v1529_v59 }
 0xf34   :  { %v3355_v60 = vpop.eup %3354 }
 0xf35   :  { %v1531_v61 = vmul.f32 %v3355_v60, %v1526_v48 }
 0xf37   :  { %1993 = vperm.xlu0 %3198, %v1531_v61   ;;  %1727 = vperm.xlu1 %3197, %v1531_v61  }
 0xf3b   :  { %3199 = vset.pattern.permute.xlu1 %v3511_v37  ;;  %3201 = vset.pattern.permute.xlu0 %v3512_v19 }
 0xf3c   :  { %2193 = vperm.xlu1 %3199, %v1531_v61  }
 0xf40   :  { %3200 = vset.pattern.permute.xlu1 %v3512_v19 }
 0xf41   :  { %2393 = vperm.xlu1 %3200, %v1531_v61  }
 0xf42   :  { %3455 = shalt.err (!%p3452_p8)
}
 0xf43   :  { %s3456_s1 = scalar_lea.hbm %s4379_s19, 128 }
 0xf44   :  { %p3457_p9 = scmp.ne.s32.totalorder %s4379_s19, %s3456_s1  ;;  %p3460_p10 = scmp.lt.u32.totalorder %s3456_s1, %s4379_s19 }
 0xf46   :  { %p3462_p11 = pnand %p3460_p10, %p3457_p9 }
 0xf48   :  { %3465 = shalt.err (!%p3462_p11)
}
 0xf49   :  { %2418 = dma.vmem_to_hbm [thread:$0]  %s2416_s13, 128, %s4379_s19, [#allocation13]  }
 0xf4a   :  { %s3514_s9 = smov [#allocation11]  }
 0xf4b   :  { %s2405_s14 = sshll.u32 %s3514_s9, 4  ;;  %s2406_s14 = int_to_ptr.vmem [resolvable:$true] %s2405_s14 }
 0xf4c   :  { %s3466_s19 = scalar_lea.vmem %s2406_s14, 128  ;;  %p3471_p13 = scmp.lt.s32.totalorder %s2406_s14, %s2406_s14 }
 0xf4d   :  { %p3467_p12 = scmp.ne.s32.totalorder %s2406_s14, %s3466_s19  ;;  %p3472_p0 = scmp.lt.s32.totalorder %s3466_s19, %s3466_s19 }
 0xf4f   :  { %p3473_p1 = por %p3472_p0, %p3471_p13 }
 0xf51   :  { %p3474_p2 = pnand %p3473_p1, %p3467_p12 }
 0xfb6   :  { %v1994_v62 = vpop.permute.xlu0 %1993  ;;  %v1728_v63 = vpop.permute.xlu1 %1727 }
 0xfb7   :  { %v1730_v1 = vmul.f32 %v1728_v63, %v4186_v49  ;;  %v1996_v2 = vmul.f32 %v1994_v62, %v4245_v27 }
 0xfb9   :  { %v1793_v4 = vadd.f32 %v4188_v53, %v1730_v1 }
 0xfbb   :  { %v1997_v5 = vadd.f32 %v1996_v2, %v1793_v4  ;;  %v2194_v6 = vpop.permute.xlu1 %2193 }
 0xfbc   :  { %v2196_v8 = vmul.f32 %v2194_v6, %v4301_v7 }
 0xfbe   :  { %v2197_v10 = vadd.f32 %v2196_v8, %v1997_v5 }
 0xfc0   :  { %v2394_v11 = vpop.permute.xlu1 %2393 }
 0xfc1   :  { %v2396_v12 = vmul.f32 %v2394_v11, %v2386_v54 }
 0xfc3   :  { %v2397_v13 = vadd.f32 %v2396_v12, %v2197_v10 }
 0xfc5   :  { %2398 = vst [vmem:[#allocation11] sm:$0xff] %v2397_v13 }
 0xfc6   :  { %3477 = shalt.err (!%p3474_p2)
}
 0xfc7   :  { %s3478_s21 = scalar_lea.hbm %s4378_s18, 128 }
 0xfc8   :  { %p3479_p3 = scmp.ne.s32.totalorder %s4378_s18, %s3478_s21  ;;  %p3482_p4 = scmp.lt.u32.totalorder %s3478_s21, %s4378_s18 }
 0xfca   :  { %p3484_p5 = pnand %p3482_p4, %p3479_p3 }
 0xfcc   :  { %3487 = shalt.err (!%p3484_p5)
}
 0xfcd   :  { %2408 = dma.vmem_to_hbm [thread:$0]  %s2406_s14, 128, %s4378_s18, [#allocation5]  }
 0xfce   :  { %3494 = dma.done.wait [#allocation5], 128  }
 0xfcf   :  { %3495 = vsyncadd [#allocation5], 4294967168 }
 0xfd0   :  { %3496 = dma.done.wait [#allocation13], 128  }
 0xfd1   :  { %3497 = vsyncadd [#allocation13], 4294967168 }
 0xfd2   :  { %2425 = vsyncpa [#allocation4], 1 }
 0xfd3   :  { %2426 = vsyncpa [#allocation7], 1 }
 0xfd4   :  { %2427 = vsyncpa [#allocation10], 1 }
 0xfd5   :  { %2428 = vsyncpa [#allocation5], 1 }
 0xfd6   :  { %2429 = vsyncpa [#allocation13], 1 }

</bundles_post_ra>
